<compile_context>
chip_gen: v7x
topology: tpu7x:2x2x1
jax: 0.10.0
libtpu: 0.0.40
codegen_flags: <defaults>
</compile_context>

<pallas_src>
import math

import jax
import jax.numpy as jnp
from jax.experimental import pallas as pl
from jax.experimental.pallas import tpu as pltpu

# Small, module-consistent shapes.
B, S, E, H = 2, 8, 32, 4          # batch, seq, embedding, heads
D = E // H                        # per-head dim = 8
EXP = 4                           # faktor_ekspansi
HFF = EXP * E                     # feed-forward hidden = 128
EPS = 1e-5                        # nn.LayerNorm default eps
LANES = 128                       # TPU lane width

# Row offsets of each weight block inside the packed (W_ROWS, 128) bf16 slab.
R_QKV1 = 0            # (E, 3E) fused self-attention Q|K|V (Q pre-scaled)
R_WO1 = R_QKV1 + E    # (E, E)  self-attention output projection (in, out)
R_WQ2 = R_WO1 + E     # (E, E)  cross-attention Q (pre-scaled, block-diag)
R_WK2 = R_WQ2 + E     # (E, E)  cross-attention K (block-diag)
R_WV2 = R_WK2 + E     # (E, E)  cross-attention V (block-diag)
R_WO2 = R_WV2 + E     # (E, E)  cross-attention output projection
R_WF1 = R_WO2 + E     # (E, HFF) feed-forward up projection
R_WF2 = R_WF1 + E     # (HFF, E) feed-forward down projection
W_ROWS = R_WF2 + HFF  # 352

# Row indices inside the packed (16, 128) f32 bias / layernorm slab.
(BR_BO1, BR_G0, BR_B0, BR_BO2, BR_G1, BR_B1,
 BR_BF1, BR_BF2, BR_G2, BR_B2) = range(10)
B_ROWS = 16


# ----------------------------- kernel helpers ------------------------------

def _layernorm(x, gamma, beta):
    mu = jnp.mean(x, axis=-1, keepdims=True)
    var = jnp.mean(jnp.square(x - mu), axis=-1, keepdims=True)
    return (x - mu) * jax.lax.rsqrt(var + EPS) * gamma + beta


def _attend(qp, kp, vp, mask_bias, bb):
    """Multi-head scaled-dot-product attention on pre-projected activations.

    qp/kp/vp: (bb*S, E) f32 with heads along lanes; qp is already scaled by
    1/sqrt(D) (folded into the packed Q weight). Heads are moved to a leading
    batch axis with static lane slices, then the score and context matmuls run
    as single (H*bb)-batched einsums and the softmax is evaluated once for all
    heads. mask_bias: (bb, S, S) additive bias (0 / -1e20) or None.
    Returns the concatenated heads, (bb*S, E) f32.
    """
    n = qp.shape[0]
    q3 = qp.astype(jnp.bfloat16).reshape(bb, S, E)     # cast once per input
    k3 = kp.astype(jnp.bfloat16).reshape(bb, S, E)
    v3 = vp.astype(jnp.bfloat16).reshape(bb, S, E)

    # (H*bb, S, D): head-major batch built from static lane slices.
    q4 = jnp.concatenate([q3[:, :, h * D:(h + 1) * D] for h in range(H)], axis=0)
    k4 = jnp.concatenate([k3[:, :, h * D:(h + 1) * D] for h in range(H)], axis=0)
    v4 = jnp.concatenate([v3[:, :, h * D:(h + 1) * D] for h in range(H)], axis=0)

    s = jnp.einsum("zqd,zkd->zqk", q4, k4, preferred_element_type=jnp.float32)
    if mask_bias is not None:
        s = s + jnp.concatenate([mask_bias] * H, axis=0)   # z = h*bb + b
    s = s - jnp.max(s, axis=-1, keepdims=True)
    p = jnp.exp(s)
    p = p * pl.reciprocal(jnp.sum(p, axis=-1, keepdims=True), approx=True)
    ctx = jnp.einsum("zqk,zkd->zqd", p.astype(jnp.bfloat16), v4,
                     preferred_element_type=jnp.float32)    # (H*bb, S, D)

    # Back to (bb*S, E): heads re-concatenated along lanes in head order.
    return jnp.concatenate(
        [ctx[h * bb:(h + 1) * bb] for h in range(H)], axis=-1).reshape(n, E)


# --------------------------------- kernel ----------------------------------

def decoder_block_kernel(mask_ref, key_ref, query_ref, x_ref, w_ref, b_ref,
                         out_ref):
    bb = x_ref.shape[0]
    n = bb * S
    x2 = x_ref[...].reshape(n, E)            # decoder input
    key2 = key_ref[...].reshape(n, E)        # encoder key stream
    query2 = query_ref[...].reshape(n, E)    # encoder query stream
    mask = mask_ref[...].reshape(bb, S, S)   # look-ahead mask
    # Additive mask bias, computed once (hoisted out of the attention heads).
    mask_bias = jnp.where(mask == 0, jnp.float32(-1e20), jnp.float32(0.0))

    # Bias / layernorm rows from the packed f32 slab (static views).
    def brow(r, width=E):
        return b_ref[r:r + 1, 0:width]

    bo1, g0, b0 = brow(BR_BO1), brow(BR_G0), brow(BR_B0)
    bo2, g1, b1 = brow(BR_BO2), brow(BR_G1), brow(BR_B1)
    bf1, bf2 = brow(BR_BF1, HFF), brow(BR_BF2)
    g2, b2 = brow(BR_G2), brow(BR_B2)

    # (1) masked self-attention; fused Q|K|V projection (one MXU push).
    x_bf = x2.astype(jnp.bfloat16)
    qkv1 = jnp.dot(x_bf, w_ref[R_QKV1:R_QKV1 + E, 0:3 * E],
                   preferred_element_type=jnp.float32)       # (n, 3E), Q scaled
    ctx1 = _attend(qkv1[:, 0:E], qkv1[:, E:2 * E], qkv1[:, 2 * E:3 * E],
                   mask_bias, bb)
    attn1 = jnp.dot(ctx1.astype(jnp.bfloat16), w_ref[R_WO1:R_WO1 + E, 0:E],
                    preferred_element_type=jnp.float32) + bo1

    # (2) residual + layernorm (dropout is identity at inference).
    value = _layernorm(attn1 + x2, g0, b0)

    # (3) cross-attention: Q = encoder query, K = encoder key, V = value.
    qp = jnp.dot(query2.astype(jnp.bfloat16), w_ref[R_WQ2:R_WQ2 + E, 0:E],
                 preferred_element_type=jnp.float32)
    kp = jnp.dot(key2.astype(jnp.bfloat16), w_ref[R_WK2:R_WK2 + E, 0:E],
                 preferred_element_type=jnp.float32)
    vp = jnp.dot(value.astype(jnp.bfloat16), w_ref[R_WV2:R_WV2 + E, 0:E],
                 preferred_element_type=jnp.float32)
    ctx2 = _attend(qp, kp, vp, None, bb)
    attn2 = jnp.dot(ctx2.astype(jnp.bfloat16), w_ref[R_WO2:R_WO2 + E, 0:E],
                    preferred_element_type=jnp.float32) + bo2
    n1 = _layernorm(attn2 + value, g1, b1)

    # (4) feed-forward: Linear -> ReLU -> Linear, residual, layernorm.
    hidden = jnp.maximum(
        jnp.dot(n1.astype(jnp.bfloat16), w_ref[R_WF1:R_WF1 + E, 0:HFF],
                preferred_element_type=jnp.float32) + bf1, 0.0)
    ff = jnp.dot(hidden.astype(jnp.bfloat16), w_ref[R_WF2:R_WF2 + HFF, 0:E],
                 preferred_element_type=jnp.float32) + bf2
    out = _layernorm(ff + n1, g2, b2)

    # Full-width (unmasked) store: pad the 32 real lanes up to 128.
    out_ref[...] = jnp.concatenate(
        [out, jnp.zeros((n, LANES - E), jnp.float32)], axis=-1)


# ------------------------ host-side weight preparation ----------------------

def pack_params(p):
    """Pack all torch-convention parameters into two lane-dense slabs.

    Returns {"w": (W_ROWS, 128) bf16, "b": (B_ROWS, 128) f32}.
      * Per-head (D, D) Q/K/V weights -> (E, E) block-diagonal kron(I_H, W^T)
        so one full-width x @ W matmul applies every head's nn.Linear(D, D).
      * 1/sqrt(D) folded into the Q weights.
      * wo / wf1 / wf2 transposed to (in, out) layout.
      * Everything zero-padded to 128 lanes and stacked along sublanes.
    """
    inv_sqrt_d = 1.0 / math.sqrt(D)
    eye_h = jnp.eye(H, dtype=jnp.float32)

    def bd(w, scale=1.0):                    # per-head (D, D) (out,in) -> (E, E)
        return jnp.kron(eye_h, w.T.astype(jnp.float32)) * scale

    def pad_lanes(w):
        return jnp.pad(w, ((0, 0), (0, LANES - w.shape[1])))

    qkv1 = jnp.concatenate(
        [bd(p["wq1"], inv_sqrt_d), bd(p["wk1"]), bd(p["wv1"])], axis=1)  # (E, 3E)
    w_blocks = [
        qkv1,                          # R_QKV1
        p["wo1"].T,                    # R_WO1
        bd(p["wq2"], inv_sqrt_d),      # R_WQ2
        bd(p["wk2"]),                  # R_WK2
        bd(p["wv2"]),                  # R_WV2
        p["wo2"].T,                    # R_WO2
        p["wf1"].T,                    # R_WF1  (E, HFF)
        p["wf2"].T,                    # R_WF2  (HFF, E)
    ]
    w_slab = jnp.concatenate(
        [pad_lanes(blk.astype(jnp.float32)) for blk in w_blocks], axis=0
    ).astype(jnp.bfloat16)
    assert w_slab.shape == (W_ROWS, LANES)

    def row(v):
        v = v.reshape(1, -1).astype(jnp.float32)
        return jnp.pad(v, ((0, 0), (0, LANES - v.shape[1])))

    b_rows = [row(p["bo1"]), row(p["g0"]), row(p["b0"]),
              row(p["bo2"]), row(p["g1"]), row(p["b1"]),
              row(p["bf1"]), row(p["bf2"]), row(p["g2"]), row(p["b2"])]
    b_slab = jnp.concatenate(
        b_rows + [jnp.zeros((B_ROWS - len(b_rows), LANES), jnp.float32)], axis=0)
    assert b_slab.shape == (B_ROWS, LANES)
    return {"w": w_slab, "b": b_slab}


# --------------------------------- wrapper ----------------------------------

def decoder_block(enc_key, enc_query, x, mask, packed, batch_block=None):
    """DecoderBlock forward as one pallas_call.

    Default grid=(1,): the whole (tiny) batch in a single invocation so the
    two parameter slabs are DMA'd exactly once (splitting across v7x's two
    TensorCores would duplicate the weight DMAs + startup for sub-us compute).
    """
    if batch_block is None:
        batch_block = B
    assert B % batch_block == 0
    w_slab, b_slab = packed["w"], packed["b"]

    seq_spec = pl.BlockSpec((batch_block, S, E), lambda b: (b, 0, 0))
    mask_spec = pl.BlockSpec((batch_block, 1, S, S), lambda b: (b, 0, 0, 0))
    w_spec = pl.BlockSpec((W_ROWS, LANES), lambda b: (0, 0))
    b_spec = pl.BlockSpec((B_ROWS, LANES), lambda b: (0, 0))
    out_spec = pl.BlockSpec((batch_block * S, LANES), lambda b: (b, 0))

    semantics = ("arbitrary",) if batch_block == B else ("parallel",)
    padded = pl.pallas_call(
        decoder_block_kernel,
        out_shape=jax.ShapeDtypeStruct((B * S, LANES), jnp.float32),
        grid_spec=pltpu.PrefetchScalarGridSpec(
            num_scalar_prefetch=0,
            grid=(B // batch_block,),
            in_specs=[mask_spec, seq_spec, seq_spec, seq_spec, w_spec, b_spec],
            out_specs=out_spec,
        ),
        compiler_params=pltpu.CompilerParams(dimension_semantics=semantics),
    )(mask, enc_key, enc_query, x, w_slab, b_slab)
    # Strip the lane padding and restore (B, S, E).
    return padded[:, :E].reshape(B, S, E)


# ----------------------------- pure-JAX reference ---------------------------

def _dot(eq, *ops):
    return jnp.einsum(eq, *ops, precision=jax.lax.Precision.HIGHEST)


def _mha_ref(k, q, v, wq, wk, wv, wo, bo, mask):
    b, sk, _ = k.shape
    sq = q.shape[1]
    kh = _dot("bshd,ed->bshe", k.reshape(b, sk, H, D), wk)
    qh = _dot("bshd,ed->bshe", q.reshape(b, sq, H, D), wq)
    vh = _dot("bshd,ed->bshe", v.reshape(b, sk, H, D), wv)
    scores = _dot("bqhd,bkhd->bhqk", qh, kh)
    if mask is not None:
        scores = jnp.where(mask == 0, -1e20, scores)
    scores = scores / math.sqrt(D)
    probs = jax.nn.softmax(scores, axis=-1)
    out = _dot("bhqk,bkhd->bqhd", probs, vh).reshape(b, sq, E)
    return _dot("bse,oe->bso", out, wo) + bo.reshape(E)


def decoder_block_ref(enc_key, enc_query, x, mask, p):
    def ln(t, g, be):
        mu = t.mean(-1, keepdims=True)
        var = ((t - mu) ** 2).mean(-1, keepdims=True)
        return (t - mu) / jnp.sqrt(var + EPS) * g.reshape(-1) + be.reshape(-1)

    a1 = _mha_ref(x, x, x, p["wq1"], p["wk1"], p["wv1"], p["wo1"], p["bo1"], mask)
    value = ln(a1 + x, p["g0"], p["b0"])
    a2 = _mha_ref(enc_key, enc_query, value,
                  p["wq2"], p["wk2"], p["wv2"], p["wo2"], p["bo2"], None)
    n1 = ln(a2 + value, p["g1"], p["b1"])
    hid = jnp.maximum(_dot("bse,he->bsh", n1, p["wf1"]) + p["bf1"].reshape(-1), 0.0)
    ff = _dot("bsh,eh->bse", hid, p["wf2"]) + p["bf2"].reshape(-1)
    return ln(ff + n1, p["g2"], p["b2"])


# ----------------------------------- main -----------------------------------

if __name__ == "__main__":
    root = jax.random.PRNGKey(0)
    keys = jax.random.split(root, 20)

    def nrm(k, shape, scale=0.1):
        return (scale * jax.random.normal(k, shape)).astype(jnp.float32)

    params = {
        # decoder self-attention
        "wq1": nrm(keys[0], (D, D)), "wk1": nrm(keys[1], (D, D)), "wv1": nrm(keys[2], (D, D)),
        "wo1": nrm(keys[3], (E, E)), "bo1": nrm(keys[4], (1, E)),
        # post-self-attention layernorm
        "g0": jnp.ones((1, E), jnp.float32), "b0": jnp.zeros((1, E), jnp.float32),
        # TransformerBlock cross-attention
        "wq2": nrm(keys[5], (D, D)), "wk2": nrm(keys[6], (D, D)), "wv2": nrm(keys[7], (D, D)),
        "wo2": nrm(keys[8], (E, E)), "bo2": nrm(keys[9], (1, E)),
        "g1": jnp.ones((1, E), jnp.float32), "b1": jnp.zeros((1, E), jnp.float32),
        # feed-forward
        "wf1": nrm(keys[10], (HFF, E)), "bf1": nrm(keys[11], (1, HFF)),
        "wf2": nrm(keys[12], (E, HFF)), "bf2": nrm(keys[13], (1, E)),
        "g2": jnp.ones((1, E), jnp.float32), "b2": jnp.zeros((1, E), jnp.float32),
    }

    enc_key = jax.random.normal(keys[14], (B, S, E), jnp.float32)
    enc_query = jax.random.normal(keys[15], (B, S, E), jnp.float32)
    x = jax.random.normal(keys[16], (B, S, E), jnp.float32)
    # look-ahead mask, shape (B, 1, S, S); 0 => masked
    mask = jnp.broadcast_to(jnp.tril(jnp.ones((S, S), jnp.float32)),
                            (B, 1, S, S)).astype(jnp.float32)

    kparams = pack_params(params)
    out = decoder_block(enc_key, enc_query, x, mask, kparams)
    out = jax.block_until_ready(out)

    ref = decoder_block_ref(enc_key, enc_query, x, mask, params)
    assert out.shape == (B, S, E) and out.dtype == jnp.float32
    # Tolerance covers bf16 MXU operands (f32 accumulation) through 2 MHAs,
    # the FFN and 3 layernorms plus the approx softmax reciprocal; the f32
    # reference is exact-precision.
    max_err = float(jnp.max(jnp.abs(out - ref)))
    if not (max_err < 5e-2):
        raise AssertionError(f"kernel/reference mismatch: max abs err {max_err}")
    print("KERNEL_OK")
</pallas_src>

<mosaic_0001>
module attributes {stable_mosaic.version = 11 : i64} {
  func.func @decoder_block_kernel(%arg0: i32, %arg1: memref<2x1x8x8xf32, #tpu.memory_space<vmem>>, %arg2: memref<2x8x32xf32, #tpu.memory_space<vmem>>, %arg3: memref<2x8x32xf32, #tpu.memory_space<vmem>>, %arg4: memref<2x8x32xf32, #tpu.memory_space<vmem>>, %arg5: memref<352x128xbf16, #tpu.memory_space<vmem>>, %arg6: memref<16x128xf32, #tpu.memory_space<vmem>>, %arg7: memref<16x128xf32, #tpu.memory_space<vmem>>) attributes {dimension_semantics = [#tpu.dimension_semantics<arbitrary>], iteration_bounds = array<i64: 1>, scalar_prefetch = 0 : i64, scratch_operands = 0 : i64, tpu.core_type = #tpu.core_type<tc>, window_params = [{transform_indices = @transform_0, window_bounds = array<i64: 2, 1, 8, 8>}, {transform_indices = @transform_1, window_bounds = array<i64: 2, 8, 32>}, {transform_indices = @transform_2, window_bounds = array<i64: 2, 8, 32>}, {transform_indices = @transform_3, window_bounds = array<i64: 2, 8, 32>}, {pipeline_mode = #tpu.pipeline_mode<synchronous>, transform_indices = @transform_4, window_bounds = array<i64: 352, 128>}, {pipeline_mode = #tpu.pipeline_mode<synchronous>, transform_indices = @transform_5, window_bounds = array<i64: 16, 128>}, {transform_indices = @transform_6, window_bounds = array<i64: 16, 128>}]} {
    %c0 = arith.constant 0 : index
    %c0_0 = arith.constant 0 : index
    %c0_1 = arith.constant 0 : index
    %0 = vector.load %arg4[%c0, %c0_0, %c0_1] : memref<2x8x32xf32, #tpu.memory_space<vmem>>, vector<2x8x32xf32>
    %1 = vector.shape_cast %0 : vector<2x8x32xf32> to vector<16x32xf32>
    %c0_2 = arith.constant 0 : index
    %c0_3 = arith.constant 0 : index
    %c0_4 = arith.constant 0 : index
    %2 = vector.load %arg2[%c0_2, %c0_3, %c0_4] : memref<2x8x32xf32, #tpu.memory_space<vmem>>, vector<2x8x32xf32>
    %3 = vector.shape_cast %2 : vector<2x8x32xf32> to vector<16x32xf32>
    %c0_5 = arith.constant 0 : index
    %c0_6 = arith.constant 0 : index
    %c0_7 = arith.constant 0 : index
    %4 = vector.load %arg3[%c0_5, %c0_6, %c0_7] : memref<2x8x32xf32, #tpu.memory_space<vmem>>, vector<2x8x32xf32>
    %5 = vector.shape_cast %4 : vector<2x8x32xf32> to vector<16x32xf32>
    %c0_8 = arith.constant 0 : index
    %c0_9 = arith.constant 0 : index
    %c0_10 = arith.constant 0 : index
    %c0_11 = arith.constant 0 : index
    %6 = vector.load %arg1[%c0_8, %c0_9, %c0_10, %c0_11] : memref<2x1x8x8xf32, #tpu.memory_space<vmem>>, vector<2x1x8x8xf32>
    %7 = vector.shape_cast %6 : vector<2x1x8x8xf32> to vector<2x8x8xf32>
    %cst = arith.constant 0.000000e+00 : f32
    %8 = vector.broadcast %cst : f32 to vector<2x8x8xf32>
    %9 = arith.cmpf oeq, %7, %8 : vector<2x8x8xf32>
    %cst_12 = arith.constant -1.000000e+20 : f32
    %cst_13 = arith.constant 0.000000e+00 : f32
    %10 = vector.broadcast %cst_12 : f32 to vector<2x8x8xf32>
    %11 = vector.broadcast %cst_13 : f32 to vector<2x8x8xf32>
    %12 = arith.select %9, %10, %11 : vector<2x8x8xi1>, vector<2x8x8xf32>
    %c0_14 = arith.constant 0 : index
    %c0_15 = arith.constant 0 : index
    %13 = vector.load %arg6[%c0_14, %c0_15] : memref<16x128xf32, #tpu.memory_space<vmem>>, vector<1x32xf32>
    %c1 = arith.constant 1 : index
    %c0_16 = arith.constant 0 : index
    %14 = vector.load %arg6[%c1, %c0_16] : memref<16x128xf32, #tpu.memory_space<vmem>>, vector<1x32xf32>
    %c2 = arith.constant 2 : index
    %c0_17 = arith.constant 0 : index
    %15 = vector.load %arg6[%c2, %c0_17] : memref<16x128xf32, #tpu.memory_space<vmem>>, vector<1x32xf32>
    %c3 = arith.constant 3 : index
    %c0_18 = arith.constant 0 : index
    %16 = vector.load %arg6[%c3, %c0_18] : memref<16x128xf32, #tpu.memory_space<vmem>>, vector<1x32xf32>
    %c4 = arith.constant 4 : index
    %c0_19 = arith.constant 0 : index
    %17 = vector.load %arg6[%c4, %c0_19] : memref<16x128xf32, #tpu.memory_space<vmem>>, vector<1x32xf32>
    %c5 = arith.constant 5 : index
    %c0_20 = arith.constant 0 : index
    %18 = vector.load %arg6[%c5, %c0_20] : memref<16x128xf32, #tpu.memory_space<vmem>>, vector<1x32xf32>
    %c6 = arith.constant 6 : index
    %c0_21 = arith.constant 0 : index
    %19 = vector.load %arg6[%c6, %c0_21] : memref<16x128xf32, #tpu.memory_space<vmem>>, vector<1x128xf32>
    %c7 = arith.constant 7 : index
    %c0_22 = arith.constant 0 : index
    %20 = vector.load %arg6[%c7, %c0_22] : memref<16x128xf32, #tpu.memory_space<vmem>>, vector<1x32xf32>
    %c8 = arith.constant 8 : index
    %c0_23 = arith.constant 0 : index
    %21 = vector.load %arg6[%c8, %c0_23] : memref<16x128xf32, #tpu.memory_space<vmem>>, vector<1x32xf32>
    %c9 = arith.constant 9 : index
    %c0_24 = arith.constant 0 : index
    %22 = vector.load %arg6[%c9, %c0_24] : memref<16x128xf32, #tpu.memory_space<vmem>>, vector<1x32xf32>
    %23 = arith.truncf %1 : vector<16x32xf32> to vector<16x32xbf16>
    %c0_25 = arith.constant 0 : index
    %c0_26 = arith.constant 0 : index
    %24 = vector.load %arg5[%c0_25, %c0_26] : memref<352x128xbf16, #tpu.memory_space<vmem>>, vector<32x96xbf16>
    %cst_27 = arith.constant dense<0.000000e+00> : vector<16x96xf32>
    %25 = tpu.matmul %23, %24, %cst_27 {dimension_numbers = #tpu.dot_dimension_numbers<[1], [0], [0], [1], [0, 0, 1, 1], [], []>} : vector<16x32xbf16>, vector<32x96xbf16>, vector<16x96xf32> -> vector<16x96xf32>
    %26 = vector.extract_strided_slice %25 {offsets = [0, 0], sizes = [16, 32], strides = [1, 1]} : vector<16x96xf32> to vector<16x32xf32>
    %27 = vector.extract_strided_slice %25 {offsets = [0, 32], sizes = [16, 32], strides = [1, 1]} : vector<16x96xf32> to vector<16x32xf32>
    %28 = vector.extract_strided_slice %25 {offsets = [0, 64], sizes = [16, 32], strides = [1, 1]} : vector<16x96xf32> to vector<16x32xf32>
    %29 = arith.truncf %26 : vector<16x32xf32> to vector<16x32xbf16>
    %30 = vector.shape_cast %29 : vector<16x32xbf16> to vector<2x8x32xbf16>
    %31 = arith.truncf %27 : vector<16x32xf32> to vector<16x32xbf16>
    %32 = vector.shape_cast %31 : vector<16x32xbf16> to vector<2x8x32xbf16>
    %33 = arith.truncf %28 : vector<16x32xf32> to vector<16x32xbf16>
    %34 = vector.shape_cast %33 : vector<16x32xbf16> to vector<2x8x32xbf16>
    %35 = vector.extract_strided_slice %30 {offsets = [0, 0, 0], sizes = [2, 8, 8], strides = [1, 1, 1]} : vector<2x8x32xbf16> to vector<2x8x8xbf16>
    %36 = vector.extract_strided_slice %30 {offsets = [0, 0, 8], sizes = [2, 8, 8], strides = [1, 1, 1]} : vector<2x8x32xbf16> to vector<2x8x8xbf16>
    %37 = vector.extract_strided_slice %30 {offsets = [0, 0, 16], sizes = [2, 8, 8], strides = [1, 1, 1]} : vector<2x8x32xbf16> to vector<2x8x8xbf16>
    %38 = vector.extract_strided_slice %30 {offsets = [0, 0, 24], sizes = [2, 8, 8], strides = [1, 1, 1]} : vector<2x8x32xbf16> to vector<2x8x8xbf16>
    %39 = tpu.concatenate %35, %36, %37, %38 in 0 : vector<2x8x8xbf16>, vector<2x8x8xbf16>, vector<2x8x8xbf16>, vector<2x8x8xbf16> -> vector<8x8x8xbf16>
    %40 = vector.extract_strided_slice %32 {offsets = [0, 0, 0], sizes = [2, 8, 8], strides = [1, 1, 1]} : vector<2x8x32xbf16> to vector<2x8x8xbf16>
    %41 = vector.extract_strided_slice %32 {offsets = [0, 0, 8], sizes = [2, 8, 8], strides = [1, 1, 1]} : vector<2x8x32xbf16> to vector<2x8x8xbf16>
    %42 = vector.extract_strided_slice %32 {offsets = [0, 0, 16], sizes = [2, 8, 8], strides = [1, 1, 1]} : vector<2x8x32xbf16> to vector<2x8x8xbf16>
    %43 = vector.extract_strided_slice %32 {offsets = [0, 0, 24], sizes = [2, 8, 8], strides = [1, 1, 1]} : vector<2x8x32xbf16> to vector<2x8x8xbf16>
    %44 = tpu.concatenate %40, %41, %42, %43 in 0 : vector<2x8x8xbf16>, vector<2x8x8xbf16>, vector<2x8x8xbf16>, vector<2x8x8xbf16> -> vector<8x8x8xbf16>
    %45 = vector.extract_strided_slice %34 {offsets = [0, 0, 0], sizes = [2, 8, 8], strides = [1, 1, 1]} : vector<2x8x32xbf16> to vector<2x8x8xbf16>
    %46 = vector.extract_strided_slice %34 {offsets = [0, 0, 8], sizes = [2, 8, 8], strides = [1, 1, 1]} : vector<2x8x32xbf16> to vector<2x8x8xbf16>
    %47 = vector.extract_strided_slice %34 {offsets = [0, 0, 16], sizes = [2, 8, 8], strides = [1, 1, 1]} : vector<2x8x32xbf16> to vector<2x8x8xbf16>
    %48 = vector.extract_strided_slice %34 {offsets = [0, 0, 24], sizes = [2, 8, 8], strides = [1, 1, 1]} : vector<2x8x32xbf16> to vector<2x8x8xbf16>
    %49 = tpu.concatenate %45, %46, %47, %48 in 0 : vector<2x8x8xbf16>, vector<2x8x8xbf16>, vector<2x8x8xbf16>, vector<2x8x8xbf16> -> vector<8x8x8xbf16>
    "tpu.trace_start"() <{level = 10 : i32, message = "zqd,zkd->zqk"}> : () -> ()
    %cst_28 = arith.constant dense<0.000000e+00> : vector<8x8x8xf32>
    %50 = tpu.matmul %39, %44, %cst_28 {dimension_numbers = #tpu.dot_dimension_numbers<[2], [2], [1], [1], [0, 0, 0, 1, 1, 1], [0], [0]>} : vector<8x8x8xbf16>, vector<8x8x8xbf16>, vector<8x8x8xf32> -> vector<8x8x8xf32>
    "tpu.trace_stop"() : () -> ()
    %51 = tpu.concatenate %12, %12, %12, %12 in 0 : vector<2x8x8xf32>, vector<2x8x8xf32>, vector<2x8x8xf32>, vector<2x8x8xf32> -> vector<8x8x8xf32>
    %52 = arith.addf %50, %51 : vector<8x8x8xf32>
    %cst_29 = arith.constant dense<0xFF800000> : vector<8x8xf32>
    %53 = vector.multi_reduction <maximumf>, %52, %cst_29 [2] : vector<8x8x8xf32> to vector<8x8xf32>
    %54 = vector.shape_cast %53 : vector<8x8xf32> to vector<8x8x1xf32>
    %55 = vector.broadcast %54 : vector<8x8x1xf32> to vector<8x8x8xf32>
    %56 = arith.subf %52, %55 : vector<8x8x8xf32>
    %57 = math.exp %56 : vector<8x8x8xf32>
    %cst_30 = arith.constant dense<0.000000e+00> : vector<8x8xf32>
    %58 = vector.multi_reduction <add>, %57, %cst_30 [2] : vector<8x8x8xf32> to vector<8x8xf32>
    %59 = vector.shape_cast %58 : vector<8x8xf32> to vector<8x8x1xf32>
    %60 = tpu.reciprocal %59 {approx = true} : vector<8x8x1xf32> -> vector<8x8x1xf32>
    %61 = vector.broadcast %60 : vector<8x8x1xf32> to vector<8x8x8xf32>
    %62 = arith.mulf %57, %61 : vector<8x8x8xf32>
    %63 = arith.truncf %62 : vector<8x8x8xf32> to vector<8x8x8xbf16>
    "tpu.trace_start"() <{level = 10 : i32, message = "zqk,zkd->zqd"}> : () -> ()
    %cst_31 = arith.constant dense<0.000000e+00> : vector<8x8x8xf32>
    %64 = tpu.matmul %63, %49, %cst_31 {dimension_numbers = #tpu.dot_dimension_numbers<[2], [1], [1], [2], [0, 0, 0, 1, 1, 2], [0], [0]>} : vector<8x8x8xbf16>, vector<8x8x8xbf16>, vector<8x8x8xf32> -> vector<8x8x8xf32>
    "tpu.trace_stop"() : () -> ()
    %65 = vector.extract_strided_slice %64 {offsets = [0, 0, 0], sizes = [2, 8, 8], strides = [1, 1, 1]} : vector<8x8x8xf32> to vector<2x8x8xf32>
    %66 = vector.extract_strided_slice %64 {offsets = [2, 0, 0], sizes = [2, 8, 8], strides = [1, 1, 1]} : vector<8x8x8xf32> to vector<2x8x8xf32>
    %67 = vector.extract_strided_slice %64 {offsets = [4, 0, 0], sizes = [2, 8, 8], strides = [1, 1, 1]} : vector<8x8x8xf32> to vector<2x8x8xf32>
    %68 = vector.extract_strided_slice %64 {offsets = [6, 0, 0], sizes = [2, 8, 8], strides = [1, 1, 1]} : vector<8x8x8xf32> to vector<2x8x8xf32>
    %69 = tpu.concatenate %65, %66, %67, %68 in 2 : vector<2x8x8xf32>, vector<2x8x8xf32>, vector<2x8x8xf32>, vector<2x8x8xf32> -> vector<2x8x32xf32>
    %70 = vector.shape_cast %69 : vector<2x8x32xf32> to vector<16x32xf32>
    %71 = arith.truncf %70 : vector<16x32xf32> to vector<16x32xbf16>
    %c32 = arith.constant 32 : index
    %c0_32 = arith.constant 0 : index
    %72 = vector.load %arg5[%c32, %c0_32] : memref<352x128xbf16, #tpu.memory_space<vmem>>, vector<32x32xbf16>
    %cst_33 = arith.constant dense<0.000000e+00> : vector<16x32xf32>
    %73 = tpu.matmul %71, %72, %cst_33 {dimension_numbers = #tpu.dot_dimension_numbers<[1], [0], [0], [1], [0, 0, 1, 1], [], []>} : vector<16x32xbf16>, vector<32x32xbf16>, vector<16x32xf32> -> vector<16x32xf32>
    %74 = vector.broadcast %13 : vector<1x32xf32> to vector<16x32xf32>
    %75 = arith.addf %73, %74 : vector<16x32xf32>
    %76 = arith.addf %75, %1 : vector<16x32xf32>
    %cst_34 = arith.constant dense<0.000000e+00> : vector<16xf32>
    %77 = vector.multi_reduction <add>, %76, %cst_34 [1] : vector<16x32xf32> to vector<16xf32>
    %78 = vector.shape_cast %77 : vector<16xf32> to vector<16x1xf32>
    %cst_35 = arith.constant 3.200000e+01 : f32
    %79 = vector.broadcast %cst_35 : f32 to vector<16x1xf32>
    %80 = arith.divf %78, %79 : vector<16x1xf32>
    %81 = vector.broadcast %80 : vector<16x1xf32> to vector<16x32xf32>
    %82 = arith.subf %76, %81 : vector<16x32xf32>
    %83 = arith.mulf %82, %82 : vector<16x32xf32>
    %cst_36 = arith.constant dense<0.000000e+00> : vector<16xf32>
    %84 = vector.multi_reduction <add>, %83, %cst_36 [1] : vector<16x32xf32> to vector<16xf32>
    %85 = vector.shape_cast %84 : vector<16xf32> to vector<16x1xf32>
    %cst_37 = arith.constant 3.200000e+01 : f32
    %86 = vector.broadcast %cst_37 : f32 to vector<16x1xf32>
    %87 = arith.divf %85, %86 : vector<16x1xf32>
    %88 = vector.broadcast %80 : vector<16x1xf32> to vector<16x32xf32>
    %89 = arith.subf %76, %88 : vector<16x32xf32>
    %cst_38 = arith.constant 9.99999974E-6 : f32
    %90 = vector.broadcast %cst_38 : f32 to vector<16x1xf32>
    %91 = arith.addf %87, %90 : vector<16x1xf32>
    %92 = math.rsqrt %91 : vector<16x1xf32>
    %93 = vector.broadcast %92 : vector<16x1xf32> to vector<16x32xf32>
    %94 = arith.mulf %89, %93 : vector<16x32xf32>
    %95 = vector.broadcast %14 : vector<1x32xf32> to vector<16x32xf32>
    %96 = arith.mulf %94, %95 : vector<16x32xf32>
    %97 = vector.broadcast %15 : vector<1x32xf32> to vector<16x32xf32>
    %98 = arith.addf %96, %97 : vector<16x32xf32>
    %99 = arith.truncf %5 : vector<16x32xf32> to vector<16x32xbf16>
    %c64 = arith.constant 64 : index
    %c0_39 = arith.constant 0 : index
    %100 = vector.load %arg5[%c64, %c0_39] : memref<352x128xbf16, #tpu.memory_space<vmem>>, vector<32x32xbf16>
    %cst_40 = arith.constant dense<0.000000e+00> : vector<16x32xf32>
    %101 = tpu.matmul %99, %100, %cst_40 {dimension_numbers = #tpu.dot_dimension_numbers<[1], [0], [0], [1], [0, 0, 1, 1], [], []>} : vector<16x32xbf16>, vector<32x32xbf16>, vector<16x32xf32> -> vector<16x32xf32>
    %102 = arith.truncf %3 : vector<16x32xf32> to vector<16x32xbf16>
    %c96 = arith.constant 96 : index
    %c0_41 = arith.constant 0 : index
    %103 = vector.load %arg5[%c96, %c0_41] : memref<352x128xbf16, #tpu.memory_space<vmem>>, vector<32x32xbf16>
    %cst_42 = arith.constant dense<0.000000e+00> : vector<16x32xf32>
    %104 = tpu.matmul %102, %103, %cst_42 {dimension_numbers = #tpu.dot_dimension_numbers<[1], [0], [0], [1], [0, 0, 1, 1], [], []>} : vector<16x32xbf16>, vector<32x32xbf16>, vector<16x32xf32> -> vector<16x32xf32>
    %105 = arith.truncf %98 : vector<16x32xf32> to vector<16x32xbf16>
    %c128 = arith.constant 128 : index
    %c0_43 = arith.constant 0 : index
    %106 = vector.load %arg5[%c128, %c0_43] : memref<352x128xbf16, #tpu.memory_space<vmem>>, vector<32x32xbf16>
    %cst_44 = arith.constant dense<0.000000e+00> : vector<16x32xf32>
    %107 = tpu.matmul %105, %106, %cst_44 {dimension_numbers = #tpu.dot_dimension_numbers<[1], [0], [0], [1], [0, 0, 1, 1], [], []>} : vector<16x32xbf16>, vector<32x32xbf16>, vector<16x32xf32> -> vector<16x32xf32>
    %108 = arith.truncf %101 : vector<16x32xf32> to vector<16x32xbf16>
    %109 = vector.shape_cast %108 : vector<16x32xbf16> to vector<2x8x32xbf16>
    %110 = arith.truncf %104 : vector<16x32xf32> to vector<16x32xbf16>
    %111 = vector.shape_cast %110 : vector<16x32xbf16> to vector<2x8x32xbf16>
    %112 = arith.truncf %107 : vector<16x32xf32> to vector<16x32xbf16>
    %113 = vector.shape_cast %112 : vector<16x32xbf16> to vector<2x8x32xbf16>
    %114 = vector.extract_strided_slice %109 {offsets = [0, 0, 0], sizes = [2, 8, 8], strides = [1, 1, 1]} : vector<2x8x32xbf16> to vector<2x8x8xbf16>
    %115 = vector.extract_strided_slice %109 {offsets = [0, 0, 8], sizes = [2, 8, 8], strides = [1, 1, 1]} : vector<2x8x32xbf16> to vector<2x8x8xbf16>
    %116 = vector.extract_strided_slice %109 {offsets = [0, 0, 16], sizes = [2, 8, 8], strides = [1, 1, 1]} : vector<2x8x32xbf16> to vector<2x8x8xbf16>
    %117 = vector.extract_strided_slice %109 {offsets = [0, 0, 24], sizes = [2, 8, 8], strides = [1, 1, 1]} : vector<2x8x32xbf16> to vector<2x8x8xbf16>
    %118 = tpu.concatenate %114, %115, %116, %117 in 0 : vector<2x8x8xbf16>, vector<2x8x8xbf16>, vector<2x8x8xbf16>, vector<2x8x8xbf16> -> vector<8x8x8xbf16>
    %119 = vector.extract_strided_slice %111 {offsets = [0, 0, 0], sizes = [2, 8, 8], strides = [1, 1, 1]} : vector<2x8x32xbf16> to vector<2x8x8xbf16>
    %120 = vector.extract_strided_slice %111 {offsets = [0, 0, 8], sizes = [2, 8, 8], strides = [1, 1, 1]} : vector<2x8x32xbf16> to vector<2x8x8xbf16>
    %121 = vector.extract_strided_slice %111 {offsets = [0, 0, 16], sizes = [2, 8, 8], strides = [1, 1, 1]} : vector<2x8x32xbf16> to vector<2x8x8xbf16>
    %122 = vector.extract_strided_slice %111 {offsets = [0, 0, 24], sizes = [2, 8, 8], strides = [1, 1, 1]} : vector<2x8x32xbf16> to vector<2x8x8xbf16>
    %123 = tpu.concatenate %119, %120, %121, %122 in 0 : vector<2x8x8xbf16>, vector<2x8x8xbf16>, vector<2x8x8xbf16>, vector<2x8x8xbf16> -> vector<8x8x8xbf16>
    %124 = vector.extract_strided_slice %113 {offsets = [0, 0, 0], sizes = [2, 8, 8], strides = [1, 1, 1]} : vector<2x8x32xbf16> to vector<2x8x8xbf16>
    %125 = vector.extract_strided_slice %113 {offsets = [0, 0, 8], sizes = [2, 8, 8], strides = [1, 1, 1]} : vector<2x8x32xbf16> to vector<2x8x8xbf16>
    %126 = vector.extract_strided_slice %113 {offsets = [0, 0, 16], sizes = [2, 8, 8], strides = [1, 1, 1]} : vector<2x8x32xbf16> to vector<2x8x8xbf16>
    %127 = vector.extract_strided_slice %113 {offsets = [0, 0, 24], sizes = [2, 8, 8], strides = [1, 1, 1]} : vector<2x8x32xbf16> to vector<2x8x8xbf16>
    %128 = tpu.concatenate %124, %125, %126, %127 in 0 : vector<2x8x8xbf16>, vector<2x8x8xbf16>, vector<2x8x8xbf16>, vector<2x8x8xbf16> -> vector<8x8x8xbf16>
    "tpu.trace_start"() <{level = 10 : i32, message = "zqd,zkd->zqk"}> : () -> ()
    %cst_45 = arith.constant dense<0.000000e+00> : vector<8x8x8xf32>
    %129 = tpu.matmul %118, %123, %cst_45 {dimension_numbers = #tpu.dot_dimension_numbers<[2], [2], [1], [1], [0, 0, 0, 1, 1, 1], [0], [0]>} : vector<8x8x8xbf16>, vector<8x8x8xbf16>, vector<8x8x8xf32> -> vector<8x8x8xf32>
    "tpu.trace_stop"() : () -> ()
    %cst_46 = arith.constant dense<0xFF800000> : vector<8x8xf32>
    %130 = vector.multi_reduction <maximumf>, %129, %cst_46 [2] : vector<8x8x8xf32> to vector<8x8xf32>
    %131 = vector.shape_cast %130 : vector<8x8xf32> to vector<8x8x1xf32>
    %132 = vector.broadcast %131 : vector<8x8x1xf32> to vector<8x8x8xf32>
    %133 = arith.subf %129, %132 : vector<8x8x8xf32>
    %134 = math.exp %133 : vector<8x8x8xf32>
    %cst_47 = arith.constant dense<0.000000e+00> : vector<8x8xf32>
    %135 = vector.multi_reduction <add>, %134, %cst_47 [2] : vector<8x8x8xf32> to vector<8x8xf32>
    %136 = vector.shape_cast %135 : vector<8x8xf32> to vector<8x8x1xf32>
    %137 = tpu.reciprocal %136 {approx = true} : vector<8x8x1xf32> -> vector<8x8x1xf32>
    %138 = vector.broadcast %137 : vector<8x8x1xf32> to vector<8x8x8xf32>
    %139 = arith.mulf %134, %138 : vector<8x8x8xf32>
    %140 = arith.truncf %139 : vector<8x8x8xf32> to vector<8x8x8xbf16>
    "tpu.trace_start"() <{level = 10 : i32, message = "zqk,zkd->zqd"}> : () -> ()
    %cst_48 = arith.constant dense<0.000000e+00> : vector<8x8x8xf32>
    %141 = tpu.matmul %140, %128, %cst_48 {dimension_numbers = #tpu.dot_dimension_numbers<[2], [1], [1], [2], [0, 0, 0, 1, 1, 2], [0], [0]>} : vector<8x8x8xbf16>, vector<8x8x8xbf16>, vector<8x8x8xf32> -> vector<8x8x8xf32>
    "tpu.trace_stop"() : () -> ()
    %142 = vector.extract_strided_slice %141 {offsets = [0, 0, 0], sizes = [2, 8, 8], strides = [1, 1, 1]} : vector<8x8x8xf32> to vector<2x8x8xf32>
    %143 = vector.extract_strided_slice %141 {offsets = [2, 0, 0], sizes = [2, 8, 8], strides = [1, 1, 1]} : vector<8x8x8xf32> to vector<2x8x8xf32>
    %144 = vector.extract_strided_slice %141 {offsets = [4, 0, 0], sizes = [2, 8, 8], strides = [1, 1, 1]} : vector<8x8x8xf32> to vector<2x8x8xf32>
    %145 = vector.extract_strided_slice %141 {offsets = [6, 0, 0], sizes = [2, 8, 8], strides = [1, 1, 1]} : vector<8x8x8xf32> to vector<2x8x8xf32>
    %146 = tpu.concatenate %142, %143, %144, %145 in 2 : vector<2x8x8xf32>, vector<2x8x8xf32>, vector<2x8x8xf32>, vector<2x8x8xf32> -> vector<2x8x32xf32>
    %147 = vector.shape_cast %146 : vector<2x8x32xf32> to vector<16x32xf32>
    %148 = arith.truncf %147 : vector<16x32xf32> to vector<16x32xbf16>
    %c160 = arith.constant 160 : index
    %c0_49 = arith.constant 0 : index
    %149 = vector.load %arg5[%c160, %c0_49] : memref<352x128xbf16, #tpu.memory_space<vmem>>, vector<32x32xbf16>
    %cst_50 = arith.constant dense<0.000000e+00> : vector<16x32xf32>
    %150 = tpu.matmul %148, %149, %cst_50 {dimension_numbers = #tpu.dot_dimension_numbers<[1], [0], [0], [1], [0, 0, 1, 1], [], []>} : vector<16x32xbf16>, vector<32x32xbf16>, vector<16x32xf32> -> vector<16x32xf32>
    %151 = vector.broadcast %16 : vector<1x32xf32> to vector<16x32xf32>
    %152 = arith.addf %150, %151 : vector<16x32xf32>
    %153 = arith.addf %152, %98 : vector<16x32xf32>
    %cst_51 = arith.constant dense<0.000000e+00> : vector<16xf32>
    %154 = vector.multi_reduction <add>, %153, %cst_51 [1] : vector<16x32xf32> to vector<16xf32>
    %155 = vector.shape_cast %154 : vector<16xf32> to vector<16x1xf32>
    %cst_52 = arith.constant 3.200000e+01 : f32
    %156 = vector.broadcast %cst_52 : f32 to vector<16x1xf32>
    %157 = arith.divf %155, %156 : vector<16x1xf32>
    %158 = vector.broadcast %157 : vector<16x1xf32> to vector<16x32xf32>
    %159 = arith.subf %153, %158 : vector<16x32xf32>
    %160 = arith.mulf %159, %159 : vector<16x32xf32>
    %cst_53 = arith.constant dense<0.000000e+00> : vector<16xf32>
    %161 = vector.multi_reduction <add>, %160, %cst_53 [1] : vector<16x32xf32> to vector<16xf32>
    %162 = vector.shape_cast %161 : vector<16xf32> to vector<16x1xf32>
    %cst_54 = arith.constant 3.200000e+01 : f32
    %163 = vector.broadcast %cst_54 : f32 to vector<16x1xf32>
    %164 = arith.divf %162, %163 : vector<16x1xf32>
    %165 = vector.broadcast %157 : vector<16x1xf32> to vector<16x32xf32>
    %166 = arith.subf %153, %165 : vector<16x32xf32>
    %cst_55 = arith.constant 9.99999974E-6 : f32
    %167 = vector.broadcast %cst_55 : f32 to vector<16x1xf32>
    %168 = arith.addf %164, %167 : vector<16x1xf32>
    %169 = math.rsqrt %168 : vector<16x1xf32>
    %170 = vector.broadcast %169 : vector<16x1xf32> to vector<16x32xf32>
    %171 = arith.mulf %166, %170 : vector<16x32xf32>
    %172 = vector.broadcast %17 : vector<1x32xf32> to vector<16x32xf32>
    %173 = arith.mulf %171, %172 : vector<16x32xf32>
    %174 = vector.broadcast %18 : vector<1x32xf32> to vector<16x32xf32>
    %175 = arith.addf %173, %174 : vector<16x32xf32>
    %176 = arith.truncf %175 : vector<16x32xf32> to vector<16x32xbf16>
    %c192 = arith.constant 192 : index
    %c0_56 = arith.constant 0 : index
    %177 = vector.load %arg5[%c192, %c0_56] : memref<352x128xbf16, #tpu.memory_space<vmem>>, vector<32x128xbf16>
    %cst_57 = arith.constant dense<0.000000e+00> : vector<16x128xf32>
    %178 = tpu.matmul %176, %177, %cst_57 {dimension_numbers = #tpu.dot_dimension_numbers<[1], [0], [0], [1], [0, 0, 1, 1], [], []>} : vector<16x32xbf16>, vector<32x128xbf16>, vector<16x128xf32> -> vector<16x128xf32>
    %179 = vector.broadcast %19 : vector<1x128xf32> to vector<16x128xf32>
    %180 = arith.addf %178, %179 : vector<16x128xf32>
    %cst_58 = arith.constant 0.000000e+00 : f32
    %181 = vector.broadcast %cst_58 : f32 to vector<16x128xf32>
    %182 = arith.maximumf %180, %181 : vector<16x128xf32>
    %183 = arith.truncf %182 : vector<16x128xf32> to vector<16x128xbf16>
    %c224 = arith.constant 224 : index
    %c0_59 = arith.constant 0 : index
    %184 = vector.load %arg5[%c224, %c0_59] : memref<352x128xbf16, #tpu.memory_space<vmem>>, vector<128x32xbf16>
    %cst_60 = arith.constant dense<0.000000e+00> : vector<16x32xf32>
    %185 = tpu.matmul %183, %184, %cst_60 {dimension_numbers = #tpu.dot_dimension_numbers<[1], [0], [0], [1], [0, 0, 1, 1], [], []>} : vector<16x128xbf16>, vector<128x32xbf16>, vector<16x32xf32> -> vector<16x32xf32>
    %186 = vector.broadcast %20 : vector<1x32xf32> to vector<16x32xf32>
    %187 = arith.addf %185, %186 : vector<16x32xf32>
    %188 = arith.addf %187, %175 : vector<16x32xf32>
    %cst_61 = arith.constant dense<0.000000e+00> : vector<16xf32>
    %189 = vector.multi_reduction <add>, %188, %cst_61 [1] : vector<16x32xf32> to vector<16xf32>
    %190 = vector.shape_cast %189 : vector<16xf32> to vector<16x1xf32>
    %cst_62 = arith.constant 3.200000e+01 : f32
    %191 = vector.broadcast %cst_62 : f32 to vector<16x1xf32>
    %192 = arith.divf %190, %191 : vector<16x1xf32>
    %193 = vector.broadcast %192 : vector<16x1xf32> to vector<16x32xf32>
    %194 = arith.subf %188, %193 : vector<16x32xf32>
    %195 = arith.mulf %194, %194 : vector<16x32xf32>
    %cst_63 = arith.constant dense<0.000000e+00> : vector<16xf32>
    %196 = vector.multi_reduction <add>, %195, %cst_63 [1] : vector<16x32xf32> to vector<16xf32>
    %197 = vector.shape_cast %196 : vector<16xf32> to vector<16x1xf32>
    %cst_64 = arith.constant 3.200000e+01 : f32
    %198 = vector.broadcast %cst_64 : f32 to vector<16x1xf32>
    %199 = arith.divf %197, %198 : vector<16x1xf32>
    %200 = vector.broadcast %192 : vector<16x1xf32> to vector<16x32xf32>
    %201 = arith.subf %188, %200 : vector<16x32xf32>
    %cst_65 = arith.constant 9.99999974E-6 : f32
    %202 = vector.broadcast %cst_65 : f32 to vector<16x1xf32>
    %203 = arith.addf %199, %202 : vector<16x1xf32>
    %204 = math.rsqrt %203 : vector<16x1xf32>
    %205 = vector.broadcast %204 : vector<16x1xf32> to vector<16x32xf32>
    %206 = arith.mulf %201, %205 : vector<16x32xf32>
    %207 = vector.broadcast %21 : vector<1x32xf32> to vector<16x32xf32>
    %208 = arith.mulf %206, %207 : vector<16x32xf32>
    %209 = vector.broadcast %22 : vector<1x32xf32> to vector<16x32xf32>
    %210 = arith.addf %208, %209 : vector<16x32xf32>
    %cst_66 = arith.constant 0.000000e+00 : f32
    %211 = vector.broadcast %cst_66 : f32 to vector<16x96xf32>
    %212 = tpu.concatenate %210, %211 in 1 : vector<16x32xf32>, vector<16x96xf32> -> vector<16x128xf32>
    %c0_67 = arith.constant 0 : index
    %c0_68 = arith.constant 0 : index
    %213 = vector.load %arg7[%c0_67, %c0_68] : memref<16x128xf32, #tpu.memory_space<vmem>>, vector<16x128xf32>
    tpu.vector_store %arg7[%c0_67, %c0_68], %212 {strides = array<i32>} : memref<16x128xf32, #tpu.memory_space<vmem>>, vector<16x128xf32>,
    return
  }
  func.func @transform_0(%arg0: i32) -> (i32, i32, i32, i32) {
    %c0_i32 = arith.constant 0 : i32
    %c0_i32_0 = arith.constant 0 : i32
    %c0_i32_1 = arith.constant 0 : i32
    %c0_i32_2 = arith.constant 0 : i32
    return %arg0, %c0_i32, %c0_i32_0, %c0_i32_1 : i32, i32, i32, i32
  }
  func.func @transform_1(%arg0: i32) -> (i32, i32, i32) {
    %c0_i32 = arith.constant 0 : i32
    %c0_i32_0 = arith.constant 0 : i32
    %c0_i32_1 = arith.constant 0 : i32
    return %arg0, %c0_i32, %c0_i32_0 : i32, i32, i32
  }
  func.func @transform_2(%arg0: i32) -> (i32, i32, i32) {
    %c0_i32 = arith.constant 0 : i32
    %c0_i32_0 = arith.constant 0 : i32
    %c0_i32_1 = arith.constant 0 : i32
    return %arg0, %c0_i32, %c0_i32_0 : i32, i32, i32
  }
  func.func @transform_3(%arg0: i32) -> (i32, i32, i32) {
    %c0_i32 = arith.constant 0 : i32
    %c0_i32_0 = arith.constant 0 : i32
    %c0_i32_1 = arith.constant 0 : i32
    return %arg0, %c0_i32, %c0_i32_0 : i32, i32, i32
  }
  func.func @transform_4(%arg0: i32) -> (i32, i32) {
    %c0_i32 = arith.constant 0 : i32
    %c0_i32_0 = arith.constant 0 : i32
    %c0_i32_1 = arith.constant 0 : i32
    return %c0_i32, %c0_i32_0 : i32, i32
  }
  func.func @transform_5(%arg0: i32) -> (i32, i32) {
    %c0_i32 = arith.constant 0 : i32
    %c0_i32_0 = arith.constant 0 : i32
    %c0_i32_1 = arith.constant 0 : i32
    return %c0_i32, %c0_i32_0 : i32, i32
  }
  func.func @transform_6(%arg0: i32) -> (i32, i32) {
    %c0_i32 = arith.constant 0 : i32
    %c0_i32_0 = arith.constant 0 : i32
    return %arg0, %c0_i32 : i32, i32
  }
}

</mosaic_0001>

<bundles_post_ra>
// kernel: tpu_custom_call.1
= control target key start
LH: loop header
LB: loop body
LE: loop exit
PB: predicated region body
PF: predicated region fallthrough
CT: control target
= control target key end

     0   :  { %11 = vsyncpa [#allocation3], 0  ;;  %s4031_s0 = inlined_call_operand.hbm [shape: f32[2,1,8,8], index: 0, kind: input, shape index: {}]   ;;  %s4032_s1 = inlined_call_operand.hbm [shape: f32[2,8,32], index: 1, kind: input, shape index: {}]   ;;  %s4033_s2 = inlined_call_operand.hbm [shape: f32[2,8,32], index: 2, kind: input, shape index: {}]   ;;  %s4034_s3 = inlined_call_operand.hbm [shape: f32[2,8,32], index: 3, kind: input, shape index: {}]   ;;  %s4035_s4 = inlined_call_operand.hbm [shape: bf16[352,128], index: 4, kind: input, shape index: {}]   ;;  %s4036_s5 = inlined_call_operand.vmem [shape: f32[16,128], index: 5, kind: input, shape index: {}]   ;;  %s4037_s6 = inlined_call_operand.hbm [shape: f32[16,128], index: 6, kind: output, shape index: {}]  }
   0x1   :  { %12 = vsyncpa [#allocation6], 0 }
   0x2   :  { %13 = vsyncpa [#allocation9], 0 }
   0x3   :  { %14 = vsyncpa [#allocation4], 0  ;;  %s3396_s21 = smov [#allocation5]   ;;  %s3397_s23 = smov [#allocation8]  }
   0x4   :  { %s32_s22 = sshll.u32 %s3396_s21, 4  ;;  %s56_s24 = sshll.u32 %s3397_s23, 4  ;;  %s33_s22 = int_to_ptr.vmem [resolvable:$true] %s32_s22  ;;  %s3449_s24 = int_to_ptr.vmem [resolvable:$true] %s56_s24 }
   0x5   :  { %s3256_s27 = scalar_lea.hbm %s4032_s1, 256 }
   0x6   :  { %p3257_p0 = scmp.ne.s32.totalorder %s4032_s1, %s3256_s27  ;;  %p3260_p1 = scmp.lt.u32.totalorder %s3256_s27, %s4032_s1 }
   0x8   :  { %p3262_p2 = pnand %p3260_p1, %p3257_p0 }
   0xa   :  { %3265 = shalt.err (!%p3262_p2)
}
   0xb   :  { %s3266_s8 = scalar_lea.vmem %s33_s22, 256  ;;  %p3271_p4 = scmp.lt.s32.totalorder %s33_s22, %s33_s22 }
   0xc   :  { %p3267_p3 = scmp.ne.s32.totalorder %s33_s22, %s3266_s8  ;;  %p3272_p5 = scmp.lt.s32.totalorder %s3266_s8, %s3266_s8 }
   0xe   :  { %p3273_p6 = por %p3272_p5, %p3271_p4 }
  0x10   :  { %p3274_p7 = pnand %p3273_p6, %p3267_p3 }
  0x12   :  { %3277 = shalt.err (!%p3274_p7)
}
  0x13   :  { %s3398_s9 = smov 128   ;;  %s3399_s10 = smov 8  }
  0x14   :  { %38 = dma.hbm_to_vmem [thread:$0]  %s4032_s1, 256, %s33_s22, [#allocation6], %s3398_s9, %s3398_s9, %s3399_s10  }
  0x15   :  { %s3278_s15 = scalar_lea.hbm %s4034_s3, 256 }
  0x16   :  { %p3279_p8 = scmp.ne.s32.totalorder %s4034_s3, %s3278_s15  ;;  %p3282_p9 = scmp.lt.u32.totalorder %s3278_s15, %s4034_s3 }
  0x18   :  { %p3284_p10 = pnand %p3282_p9, %p3279_p8 }
  0x1a   :  { %3287 = shalt.err (!%p3284_p10)
}
  0x1b   :  { %s3288_s20 = scalar_lea.vmem %s3449_s24, 256  ;;  %p3293_p12 = scmp.lt.s32.totalorder %s3449_s24, %s3449_s24 }
  0x1c   :  { %p3289_p11 = scmp.ne.s32.totalorder %s3449_s24, %s3288_s20  ;;  %p3294_p13 = scmp.lt.s32.totalorder %s3288_s20, %s3288_s20 }
  0x1e   :  { %p3295_p0 = por %p3294_p13, %p3293_p12 }
  0x20   :  { %p3296_p1 = pnand %p3295_p0, %p3289_p11 }
  0x22   :  { %3299 = shalt.err (!%p3296_p1)
}
  0x23   :  { %62 = dma.hbm_to_vmem [thread:$0]  %s4034_s3, 256, %s3449_s24, [#allocation9], %s3398_s9, %s3398_s9, %s3399_s10  }
  0x24   :  { %s3400_s22 = smov [#allocation2]   ;;  %s3401_s25 = smov [#allocation7]  }
  0x25   :  { %s20_s23 = sshll.u32 %s3400_s22, 4  ;;  %s44_s26 = sshll.u32 %s3401_s25, 4  ;;  %s21_s23 = int_to_ptr.vmem [resolvable:$true] %s20_s23  ;;  %s3486_s26 = int_to_ptr.vmem [resolvable:$true] %s44_s26 }
  0x26   :  { %s3300_s29 = scalar_lea.hbm %s4031_s0, 256 }
  0x27   :  { %p3301_p2 = scmp.ne.s32.totalorder %s4031_s0, %s3300_s29  ;;  %p3304_p3 = scmp.lt.u32.totalorder %s3300_s29, %s4031_s0 }
  0x29   :  { %p3306_p4 = pnand %p3304_p3, %p3301_p2 }
  0x2b   :  { %3309 = shalt.err (!%p3306_p4)
}
  0x2c   :  { %s3310_s3 = scalar_lea.vmem %s21_s23, 256  ;;  %p3315_p6 = scmp.lt.s32.totalorder %s21_s23, %s21_s23 }
  0x2d   :  { %p3311_p5 = scmp.ne.s32.totalorder %s21_s23, %s3310_s3  ;;  %p3316_p7 = scmp.lt.s32.totalorder %s3310_s3, %s3310_s3 }
  0x2f   :  { %p3317_p8 = por %p3316_p7, %p3315_p6 }
  0x31   :  { %p3318_p9 = pnand %p3317_p8, %p3311_p5 }
  0x33   :  { %3321 = shalt.err (!%p3318_p9)
}
  0x34   :  { %26 = dma.hbm_to_vmem [thread:$0]  %s4031_s0, 256, %s21_s23, [#allocation3], %s3398_s9, %s3398_s9, %s3399_s10  }
  0x35   :  { %s3322_s15 = scalar_lea.hbm %s4033_s2, 256 }
  0x36   :  { %p3323_p10 = scmp.ne.s32.totalorder %s4033_s2, %s3322_s15  ;;  %p3326_p11 = scmp.lt.u32.totalorder %s3322_s15, %s4033_s2 }
  0x38   :  { %p3328_p12 = pnand %p3326_p11, %p3323_p10 }
  0x3a   :  { %3331 = shalt.err (!%p3328_p12)
}
  0x3b   :  { %s3332_s20 = scalar_lea.vmem %s3486_s26, 256  ;;  %p3337_p0 = scmp.lt.s32.totalorder %s3486_s26, %s3486_s26 }
  0x3c   :  { %p3333_p13 = scmp.ne.s32.totalorder %s3486_s26, %s3332_s20  ;;  %p3338_p1 = scmp.lt.s32.totalorder %s3332_s20, %s3332_s20 }
  0x3e   :  { %p3339_p2 = por %p3338_p1, %p3337_p0 }
  0x40   :  { %p3340_p3 = pnand %p3339_p2, %p3333_p13 }
  0x42   :  { %3343 = shalt.err (!%p3340_p3)
}
  0x43   :  { %50 = dma.hbm_to_vmem [thread:$0]  %s4033_s2, 256, %s3486_s26, [#allocation6], %s3398_s9, %s3398_s9, %s3399_s10  }
  0x44   :  { %s3402_s21 = smov [#allocation10]   ;;  %s3344_s27 = scalar_lea.hbm %s4035_s4, 2816 }
  0x45   :  { %s68_s22 = sshll.u32 %s3402_s21, 4  ;;  %p3345_p4 = scmp.ne.s32.totalorder %s4035_s4, %s3344_s27  ;;  %s69_s22 = int_to_ptr.vmem [resolvable:$true] %s68_s22 }
  0x46   :  { %p3348_p5 = scmp.lt.u32.totalorder %s3344_s27, %s4035_s4 }
  0x48   :  { %p3350_p6 = pnand %p3348_p5, %p3345_p4 }
  0x4a   :  { %3353 = shalt.err (!%p3350_p6)
}
  0x4b   :  { %s3354_s8 = scalar_lea.vmem %s69_s22, 2816  ;;  %p3359_p8 = scmp.lt.s32.totalorder %s69_s22, %s69_s22 }
  0x4c   :  { %p3355_p7 = scmp.ne.s32.totalorder %s69_s22, %s3354_s8  ;;  %p3360_p9 = scmp.lt.s32.totalorder %s3354_s8, %s3354_s8 }
  0x4e   :  { %p3361_p10 = por %p3360_p9, %p3359_p8 }
  0x50   :  { %p3362_p11 = pnand %p3361_p10, %p3355_p7 }
  0x52   :  { %3365 = shalt.err (!%p3362_p11)
}
  0x53   :  { %s3403_s2 = smov 64   ;;  %s3404_s26 = smov 4  }
  0x54   :  { %74 = dma.hbm_to_vmem [thread:$0]  %s4035_s4, 2816, %s69_s22, [#allocation9], %s3403_s2, %s3403_s2, %s3404_s26  }
  0x55   :  { %3388 = dma.done.wait [#allocation3], 256  }
  0x56   :  { %3389 = vsyncadd [#allocation3], 4294967040 }
  0x57   :  { %3390 = dma.done.wait [#allocation6], 512  }
  0x58   :  { %3391 = vsyncadd [#allocation6], 4294966784 }
  0x59   :  { %3392 = dma.done.wait [#allocation9], 3072  }
  0x5a   :  { %3393 = vsyncadd [#allocation9], 4294964224  ;;  %v3405_v0 = vmov 0.0   ;;  %vm3406_vm0 = vmmov 0   ;;  %v3158_v1 = vld [vmem:[#allocation10] sm:$0xff]   ;;  %v3159_v2 = vld [vmem:[#allocation10 + $0x8] sm:$0xff]  }
  0x5b   :  { %2842 = vmatprep.subr.bf16.mxu0 %v3405_v0  ;;  %2846 = vmatprep.mubr.msk.bf16.mxu0 %vm3406_vm0, %v3405_v0  ;;  %v3543_v3 = vld [vmem:[#allocation8] sm:$0xff]  ;;  %v3545_v4 = vld [vmem:[#allocation8 + $0x8] sm:$0xff]  ;;  %vm132_vm1 = vcmask 261120   ;;  %s3407_s4 = smov 112   ;;  %s3408_s24 = smov 120   ;;  %vm197_vm2 = vcmask 64512  }
  0x5c   :  { %2862 = vmatprep.subr.bf16.mxu1 %v3405_v0  ;;  %2864 = vmatprep.mubr.msk.bf16.mxu1 %vm3406_vm0, %v3405_v0  ;;  %v115_v5 = vpack.c.bf16 %v3545_v4, %v3543_v3  ;;  %s3409_s12 = smov 104   ;;  %s3410_s13 = smov 96   ;;  %vm693_vm3 = vcmask 1043456   ;;  %v99_v42 = vld [vmem:[#allocation2] sm:$0xff]  ;;  %v100_v45 = vld [vmem:[#allocation2 + $0x8] sm:$0xff]  ;;  %vm1099_vm6 = vcmask 130048  }
  0x5d   :  { %2843 = vmatpush3.bf16.msra.mxu0 %v3158_v1  ;;  %vm101_vm4 = vcmp.eq.f32.partialorder %v99_v42, 0.0  ;;  %vm102_vm5 = vcmp.eq.f32.partialorder %v100_v45, 0.0  ;;  %s3411_s14 = smov 16   ;;  %s3412_s15 = smov 24   ;;  %vm1102_vm7 = vcmask 195584  }
  0x5e   :  { %2844 = vmatprep.subr.bf16.mxu0 %v3405_v0  ;;  %v103_v43 = vsel %vm101_vm4, -1e+20, %v3405_v0  ;;  %v104_v51 = vsel %vm102_vm5, -1e+20, %v3405_v0  ;;  %s3413_s3 = smov [#allocation11]  }
  0x61   :  { %2845 = vmatpush3.bf16.msra.mxu0 %v3159_v2 }
  0x62   :  { %2850 = vmatprep.subr.bf16.mxu0 %v3405_v0 }
  0x64   :  { %2847 = vmatmul.mubr.msk.bf16.vlgmr.msra.gmra.mrb[0].mxu0 %vm132_vm1, %v115_v5 }
  0x65   :  { %2852 = vmatprep.mubr.msk.bf16.mxu0 %vm3406_vm0, %v3405_v0 }
 0x137   :  { %v170_v6 = vpop.f32.mrb[0].mxu0 }
 0x138   :  { %v2740_v7 = vpack.c.bf16 %v170_v6, %v170_v6  ;;  %v2848_v8 = vpop.f32.mrb[1].mxu0 }
 0x139   :  { %v173_v9 = vpop.f32.mrb[2].mxu0 }
 0x13a   :  { %187 = vrot.lane.b32.xlu1 %v2740_v7, %s3407_s4  ;;  %183 = vrot.lane.b32.xlu0 %v2740_v7, %s3408_s24  ;;  %v2849_v10 = vpop.f32.mrb[3].mxu0  ;;  %v3556_v11 = vpack.c.bf16 %v173_v9, %v173_v9 }
 0x13e   :  { %189 = vrot.lane.b32.xlu1 %v3556_v11, %s3407_s4  ;;  %185 = vrot.lane.b32.xlu0 %v3556_v11, %s3408_s24 }
 0x142   :  { %193 = vrot.lane.b32.xlu1 %v3556_v11, %s3409_s12  ;;  %191 = vrot.lane.b32.xlu0 %v2740_v7, %s3409_s12 }
 0x146   :  { %244 = vrot.lane.b32.xlu1 %v3556_v11, %s3410_s13  ;;  %195 = vrot.lane.b32.xlu0 %v2740_v7, %s3410_s13 }
 0x1ac   :  { %v188_v12 = vpop.permute.xlu1 %187  ;;  %v184_v13 = vpop.permute.xlu0 %183 }
 0x1ad   :  { %v3566_v14 = vcombine.low %v184_v13, %v184_v13  ;;  %v3569_v17 = vcombine.low %v188_v12, %v188_v12 }
 0x1af   :  { %294 = vrot.lane.b32.xlu0 %v3566_v14, %s3410_s13 }
 0x1b0   :  { %v190_v15 = vpop.permute.xlu1 %189  ;;  %v186_v16 = vpop.permute.xlu0 %185 }
 0x1b1   :  { %v3571_v18 = vcombine.low %v186_v16, %v186_v16  ;;  %v3575_v20 = vcombine.low %v190_v15, %v190_v15 }
 0x1b3   :  { %394 = vrot.lane.b32.xlu0 %v3569_v17, %s3410_s13  ;;  %344 = vrot.lane.b32.xlu1 %v3571_v18, %s3410_s13 }
 0x1b4   :  { %v192_v19 = vpop.permute.xlu0 %191  ;;  %v194_v22 = vpop.permute.xlu1 %193 }
 0x1b5   :  { %v3577_v21 = vcombine.low %v192_v19, %v192_v19  ;;  %v3581_v24 = vcombine.low %v194_v22, %v194_v22 }
 0x1b7   :  { %444 = vrot.lane.b32.xlu1 %v3575_v20, %s3410_s13  ;;  %494 = vrot.lane.b32.xlu0 %v3577_v21, %s3410_s13 }
 0x1b8   :  { %v196_v23 = vpop.permute.xlu0 %195  ;;  %v245_v26 = vpop.permute.xlu1 %244 }
 0x1b9   :  { %v202_v25 = vsel %vm197_vm2, %v196_v23, 0  ;;  %v250_v27 = vsel %vm197_vm2, %v245_v26, 0 }
 0x1ba   :  { %2851 = vmatpush3.bf16.xpose.msra.mxu0 %v202_v25 }
 0x1bb   :  { %544 = vrot.lane.b32.xlu1 %v3581_v24, %s3410_s13  ;;  %2856 = vmatprep.subr.bf16.mxu0 %v3405_v0 }
 0x1bf   :  { %688 = vrot.lane.b32.xlu1 %v2740_v7, %s3403_s2 }
 0x1c1   :  { %2853 = vmatmul.mubr.msk.bf16.vlgmr.msra.gmra.mrb[4].mxu0 %vm197_vm2, %v2740_v7 }
 0x1c2   :  { %2857 = vmatpush3.bf16.xpose.msra.mxu0 %v250_v27  ;;  %2858 = vmatprep.mubr.msk.bf16.mxu0 %vm3406_vm0, %v3405_v0 }
 0x1c3   :  { %2868 = vmatprep.subr.bf16.mxu0 %v3405_v0 }
 0x1c9   :  { %2859 = vmatmul.mubr.msk.bf16.vlgmr.msra.gmra.mrb[8].mxu0 %vm197_vm2, %v3556_v11 }
 0x1ca   :  { %2870 = vmatprep.mubr.msk.bf16.mxu0 %vm3406_vm0, %v3405_v0 }
 0x221   :  { %v295_v28 = vpop.permute.xlu0 %294 }
 0x222   :  { %v300_v29 = vsel %vm197_vm2, %v295_v28, 0 }
 0x223   :  { %2863 = vmatpush3.bf16.xpose.msra.mxu1 %v300_v29 }
 0x224   :  { %2874 = vmatprep.subr.bf16.mxu1 %v3405_v0 }
 0x225   :  { %v345_v30 = vpop.permute.xlu1 %344  ;;  %v395_v32 = vpop.permute.xlu0 %394 }
 0x226   :  { %v350_v31 = vsel %vm197_vm2, %v345_v30, 0  ;;  %v400_v33 = vsel %vm197_vm2, %v395_v32, 0 }
 0x227   :  { %2869 = vmatpush3.bf16.xpose.msra.mxu0 %v350_v31 }
 0x228   :  { %2880 = vmatprep.subr.bf16.mxu0 %v3405_v0 }
 0x229   :  { %v445_v34 = vpop.permute.xlu1 %444  ;;  %v495_v36 = vpop.permute.xlu0 %494 }
 0x22a   :  { %2865 = vmatmul.mubr.msk.bf16.vlgmr.msra.gmra.mrb[0].mxu1 %vm197_vm2, %v184_v13  ;;  %v450_v35 = vsel %vm197_vm2, %v445_v34, 0  ;;  %v500_v38 = vsel %vm197_vm2, %v495_v36, 0 }
 0x22b   :  { %2875 = vmatpush3.bf16.xpose.msra.mxu1 %v400_v33  ;;  %2876 = vmatprep.mubr.msk.bf16.mxu1 %vm3406_vm0, %v3405_v0 }
 0x22c   :  { %2886 = vmatprep.subr.bf16.mxu1 %v3405_v0 }
 0x22d   :  { %v545_v37 = vpop.permute.xlu1 %544 }
 0x22e   :  { %2871 = vmatmul.mubr.msk.bf16.vlgmr.msra.gmra.mrb[12].mxu0 %vm197_vm2, %v186_v16  ;;  %v550_v39 = vsel %vm197_vm2, %v545_v37, 0 }
 0x22f   :  { %2881 = vmatpush3.bf16.xpose.msra.mxu0 %v450_v35  ;;  %2882 = vmatprep.mubr.msk.bf16.mxu0 %vm3406_vm0, %v3405_v0 }
 0x230   :  { %2892 = vmatprep.subr.bf16.mxu0 %v3405_v0 }
 0x231   :  { %v689_v40 = vpop.permute.xlu1 %688 }
 0x232   :  { %2877 = vmatmul.mubr.msk.bf16.vlgmr.msra.gmra.mrb[4].mxu1 %vm197_vm2, %v188_v12  ;;  %v695_v41 = vsel %vm693_vm3, %v689_v40, 0 }
 0x233   :  { %2887 = vmatpush3.bf16.xpose.msra.mxu1 %v500_v38  ;;  %2888 = vmatprep.mubr.msk.bf16.mxu1 %vm3406_vm0, %v3405_v0 }
 0x234   :  { %2898 = vmatprep.subr.bf16.mxu1 %v3405_v0 }
 0x236   :  { %2883 = vmatmul.mubr.msk.bf16.vlgmr.msra.gmra.mrb[16].mxu0 %vm197_vm2, %v190_v15 }
 0x237   :  { %2893 = vmatpush3.bf16.xpose.msra.mxu0 %v550_v39  ;;  %2894 = vmatprep.mubr.msk.bf16.mxu0 %vm3406_vm0, %v3405_v0 }
 0x238   :  { %2904 = vmatprep.subr.bf16.mxu0 %v3405_v0 }
 0x23a   :  { %2889 = vmatmul.mubr.msk.bf16.vlgmr.msra.gmra.mrb[8].mxu1 %vm197_vm2, %v192_v19 }
 0x23b   :  { %2899 = vmatpush3.bf16.msra.mxu1 %v695_v41  ;;  %2900 = vmatprep.mubr.msk.bf16.mxu1 %vm3406_vm0, %v3405_v0 }
 0x23c   :  { %2910 = vmatprep.subr.bf16.mxu1 %v3405_v0 }
 0x23e   :  { %2895 = vmatmul.mubr.msk.bf16.vlgmr.msra.gmra.mrb[20].mxu0 %vm197_vm2, %v194_v22 }
 0x23f   :  { %2906 = vmatprep.mubr.msk.bf16.mxu0 %vm3406_vm0, %v3405_v0 }
 0x294   :  { %v238_v44 = vpop.f32.mrb[4].mxu0 }
 0x295   :  { %v3629_v46 = vadd.f32 %v238_v44, %v103_v43  ;;  %v2854_v47 = vpop.f32.mrb[5].mxu0 }
 0x296   :  { %v241_v48 = vpop.f32.mrb[6].mxu0 }
 0x297   :  { %v2855_v49 = vpop.f32.mrb[7].mxu0  ;;  %v592_v50 = vsel %vm197_vm2, %v3629_v46, -inf }
 0x298   :  { %593 = vmax.xlane.f32.xlu0 %v592_v50 }
 0x29c   :  { %v286_v52 = vpop.f32.mrb[8].mxu0 }
 0x29d   :  { %v287_v53 = vadd.f32 %v286_v52, %v104_v51  ;;  %v2860_v54 = vpop.f32.mrb[9].mxu0 }
 0x29e   :  { %v289_v55 = vpop.f32.mrb[10].mxu0 }
 0x29f   :  { %v2861_v56 = vpop.f32.mrb[11].mxu0  ;;  %v595_v57 = vsel %vm197_vm2, %v287_v53, -inf }
 0x2a0   :  { %596 = vmax.xlane.f32.xlu1 %v595_v57 }
 0x2fd   :  { %v336_v58 = vpop.f32.mrb[0].mxu1 }
 0x2fe   :  { %v337_v59 = vadd.f32 %v336_v58, %v103_v43  ;;  %v2866_v60 = vpop.f32.mrb[1].mxu1 }
 0x2ff   :  { %v339_v61 = vpop.f32.mrb[2].mxu1 }
 0x300   :  { %v2867_v62 = vpop.f32.mrb[3].mxu1  ;;  %v598_v63 = vsel %vm197_vm2, %v337_v59, -inf }
 0x301   :  { %599 = vmax.xlane.f32.xlu0 %v598_v63  ;;  %v386_v1 = vpop.f32.mrb[12].mxu0 }
 0x302   :  { %v387_v2 = vadd.f32 %v386_v1, %v104_v51  ;;  %v2872_v5 = vpop.f32.mrb[13].mxu0 }
 0x303   :  { %v389_v6 = vpop.f32.mrb[14].mxu0 }
 0x304   :  { %v2873_v7 = vpop.f32.mrb[15].mxu0  ;;  %v601_v8 = vsel %vm197_vm2, %v387_v2, -inf }
 0x305   :  { %v436_v9 = vpop.f32.mrb[4].mxu1  ;;  %602 = vmax.xlane.f32.xlu0 %v601_v8 }
 0x306   :  { %v3637_v10 = vadd.f32 %v436_v9, %v103_v43  ;;  %v2878_v12 = vpop.f32.mrb[5].mxu1 }
 0x307   :  { %v439_v13 = vpop.f32.mrb[6].mxu1 }
 0x308   :  { %v2879_v15 = vpop.f32.mrb[7].mxu1  ;;  %v604_v16 = vsel %vm197_vm2, %v3637_v10, -inf }
 0x309   :  { %605 = vmax.xlane.f32.xlu1 %v604_v16  ;;  %v486_v19 = vpop.f32.mrb[16].mxu0 }
 0x30a   :  { %v3641_v22 = vadd.f32 %v486_v19, %v104_v51  ;;  %v2884_v23 = vpop.f32.mrb[17].mxu0 }
 0x30b   :  { %v489_v25 = vpop.f32.mrb[18].mxu0 }
 0x30c   :  { %v2885_v26 = vpop.f32.mrb[19].mxu0  ;;  %v607_v27 = vsel %vm197_vm2, %v3641_v22, -inf }
 0x30d   :  { %v536_v28 = vpop.f32.mrb[8].mxu1  ;;  %608 = vmax.xlane.f32.xlu0 %v607_v27 }
 0x30e   :  { %v537_v29 = vadd.f32 %v536_v28, %v103_v43  ;;  %v2890_v30 = vpop.f32.mrb[9].mxu1 }
 0x30f   :  { %v539_v31 = vpop.f32.mrb[10].mxu1 }
 0x310   :  { %v2891_v32 = vpop.f32.mrb[11].mxu1  ;;  %v610_v33 = vsel %vm197_vm2, %v537_v29, -inf }
 0x311   :  { %611 = vmax.xlane.f32.xlu1 %v610_v33  ;;  %v586_v34 = vpop.f32.mrb[20].mxu0 }
 0x312   :  { %v587_v35 = vadd.f32 %v586_v34, %v104_v51  ;;  %v2896_v36 = vpop.f32.mrb[21].mxu0 }
 0x313   :  { %v589_v37 = vpop.f32.mrb[22].mxu0 }
 0x314   :  { %v2897_v38 = vpop.f32.mrb[23].mxu0  ;;  %v613_v39 = vsel %vm197_vm2, %v587_v35, -inf }
 0x315   :  { %614 = vmax.xlane.f32.xlu0 %v613_v39 }
 0x322   :  { %785 = vrot.lane.b32.xlu1 %v3566_v14, %s3403_s2 }
 0x325   :  { %v594_v40 = vpop.xlane.xlu0 %593 }
 0x326   :  { %833 = vrot.lane.b32.xlu1 %v3571_v18, %s3403_s2  ;;  %v616_v42 = vsub.f32 %v3629_v46, %v594_v40 }
 0x328   :  { %v624_v44 = vmul.f32 1.442695, %v616_v42 }
 0x32a   :  { %3180 = vpow2.f32 %v624_v44 }
 0x32b   :  { %737 = vrot.lane.b32.xlu0 %v3556_v11, %s3403_s2 }
 0x32d   :  { %v597_v41 = vpop.xlane.xlu1 %596 }
 0x32e   :  { %v617_v43 = vsub.f32 %v287_v53, %v597_v41 }
 0x330   :  { %v626_v45 = vmul.f32 1.442695, %v617_v43 }
 0x332   :  { %3182 = vpow2.f32 %v626_v45 }
 0x334   :  { %v3181_v47 = vpop.eup %3180 }
 0x335   :  { %v640_v49 = vsel %vm197_vm2, %v3181_v47, 0.0 }
 0x33c   :  { %v3183_v48 = vpop.eup %3182 }
 0x33d   :  { %v643_v14 = vsel %vm197_vm2, %v3183_v48, 0.0 }
 0x34a   :  { %641 = vadd.xlane.f32.xlu1 %v640_v49  ;;  %644 = vadd.xlane.f32.xlu0 %v643_v14 }
 0x38e   :  { %v600_v18 = vpop.xlane.xlu0 %599 }
 0x38f   :  { %v618_v50 = vsub.f32 %v337_v59, %v600_v18 }
 0x391   :  { %v628_v11 = vmul.f32 1.442695, %v618_v50 }
 0x392   :  { %v603_v51 = vpop.xlane.xlu0 %602 }
 0x393   :  { %3184 = vpow2.f32 %v628_v11  ;;  %v619_v52 = vsub.f32 %v387_v2, %v603_v51 }
 0x395   :  { %v630_v46 = vmul.f32 1.442695, %v619_v52 }
 0x396   :  { %v606_v61 = vpop.xlane.xlu1 %605 }
 0x397   :  { %3186 = vpow2.f32 %v630_v46  ;;  %v620_v62 = vsub.f32 %v3637_v10, %v606_v61 }
 0x399   :  { %v632_v2 = vmul.f32 1.442695, %v620_v62 }
 0x39a   :  { %v609_v54 = vpop.xlane.xlu0 %608 }
 0x39b   :  { %v621_v1 = vsub.f32 %v3641_v22, %v609_v54  ;;  %3188 = vpow2.f32 %v632_v2 }
 0x39d   :  { %v3656_v53 = vpop.eup %3184  ;;  %v634_v6 = vmul.f32 1.442695, %v621_v1 }
 0x39e   :  { %v646_v55 = vsel %vm197_vm2, %v3656_v53, 0.0  ;;  %v612_v63 = vpop.xlane.xlu1 %611 }
 0x39f   :  { %647 = vadd.xlane.f32.xlu1 %v646_v55  ;;  %v622_v5 = vsub.f32 %v537_v29, %v612_v63  ;;  %3190 = vpow2.f32 %v634_v6 }
 0x3a1   :  { %v3660_v56 = vpop.eup %3186  ;;  %v636_v7 = vmul.f32 1.442695, %v622_v5 }
 0x3a2   :  { %v615_v57 = vpop.xlane.xlu0 %614  ;;  %v649_v58 = vsel %vm197_vm2, %v3660_v56, 0.0  ;;  %v786_v12 = vpop.permute.xlu1 %785 }
 0x3a3   :  { %650 = vadd.xlane.f32.xlu0 %v649_v58  ;;  %v623_v8 = vsub.f32 %v587_v35, %v615_v57  ;;  %3192 = vpow2.f32 %v636_v7  ;;  %v791_v33 = vsel %vm693_vm3, %v786_v12, 0 }
 0x3a5   :  { %v638_v9 = vmul.f32 1.442695, %v623_v8 }
 0x3a6   :  { %v738_v59 = vpop.permute.xlu0 %737  ;;  %v834_v13 = vpop.permute.xlu1 %833 }
 0x3a7   :  { %v743_v60 = vsel %vm693_vm3, %v738_v59, 0  ;;  %3194 = vpow2.f32 %v638_v9  ;;  %v839_v34 = vsel %vm693_vm3, %v834_v13, 0 }
 0x3a8   :  { %2905 = vmatpush3.bf16.msra.mxu0 %v743_v60 }
 0x3a9   :  { %2916 = vmatprep.subr.bf16.mxu0 %v3405_v0 }
 0x3b0   :  { %929 = vrot.lane.b32.xlu1 %v3575_v20, %s3403_s2  ;;  %v3672_v20 = vpop.eup %3188 }
 0x3b1   :  { %v652_v10 = vsel %vm197_vm2, %v3672_v20, 0.0 }
 0x3b9   :  { %881 = vrot.lane.b32.xlu0 %v3569_v17, %s3403_s2  ;;  %v3674_v17 = vpop.eup %3190 }
 0x3ba   :  { %v3678_v15 = vpop.eup %3192  ;;  %v655_v23 = vsel %vm197_vm2, %v3674_v17, 0.0 }
 0x3bb   :  { %v658_v22 = vsel %vm197_vm2, %v3678_v15, 0.0  ;;  %v3684_v25 = vpop.eup %3194 }
 0x3bc   :  { %v661_v26 = vsel %vm197_vm2, %v3684_v25, 0.0 }
 0x3d4   :  { %653 = vadd.xlane.f32.xlu1 %v652_v10 }
 0x3d7   :  { %v642_v16 = vpop.xlane.xlu1 %641  ;;  %v645_v19 = vpop.xlane.xlu0 %644 }
 0x3d8   :  { %3196 = vrcp.f32 %v642_v16  ;;  %659 = vadd.xlane.f32.xlu1 %v658_v22  ;;  %656 = vadd.xlane.f32.xlu0 %v655_v23  ;;  %v3160_v22 = vld [vmem:[#allocation10 + $0x10] sm:$0xff]  }
 0x3d9   :  { %3198 = vrcp.f32 %v645_v19 }
 0x3dc   :  { %662 = vadd.xlane.f32.xlu0 %v661_v26 }
 0x3e2   :  { %v3197_v27 = vpop.eup %3196 }
 0x3e3   :  { %v3199_v28 = vpop.eup %3198  ;;  %v672_v29 = vmul.f32 %v3197_v27, %v3181_v47 }
 0x3e4   :  { %v673_v30 = vmul.f32 %v3199_v28, %v3183_v48  ;;  %v3161_v28 = vld [vmem:[#allocation10 + $0x18] sm:$0xff]  }
 0x3e5   :  { %v680_v31 = vpack.c.bf16 %v672_v29, %v672_v29 }
 0x3e6   :  { %v681_v32 = vpack.c.bf16 %v673_v30, %v673_v30 }
 0x3e7   :  { %2901 = vmatmul.mubr.msk.bf16.vlgmr.msra.gmra.mrb[12].mxu1 %vm197_vm2, %v680_v31 }
 0x3e8   :  { %2907 = vmatmul.mubr.msk.bf16.vlgmr.msra.gmra.mrb[24].mxu0 %vm197_vm2, %v681_v32  ;;  %2911 = vmatpush3.bf16.msra.mxu1 %v791_v33 }
 0x3e9   :  { %2917 = vmatpush3.bf16.msra.mxu0 %v839_v34  ;;  %1025 = vrot.lane.b32.xlu1 %v3581_v24, %s3403_s2 }
 0x3ea   :  { %2912 = vmatprep.mubr.msk.bf16.mxu1 %vm3406_vm0, %v3405_v0  ;;  %2922 = vmatprep.subr.bf16.mxu1 %v3405_v0 }
 0x3eb   :  { %2918 = vmatprep.mubr.msk.bf16.mxu0 %vm3406_vm0, %v3405_v0  ;;  %2928 = vmatprep.subr.bf16.mxu0 %v3405_v0 }
 0x3f2   :  { %977 = vrot.lane.b32.xlu0 %v3577_v21, %s3403_s2 }
 0x42c   :  { %v648_v35 = vpop.xlane.xlu1 %647 }
 0x42d   :  { %3200 = vrcp.f32 %v648_v35 }
 0x430   :  { %v651_v36 = vpop.xlane.xlu0 %650  ;;  %v930_v43 = vpop.permute.xlu1 %929 }
 0x431   :  { %3202 = vrcp.f32 %v651_v36  ;;  %v935_v44 = vsel %vm693_vm3, %v930_v43, 0  ;;  %v3165_v43 = vld [vmem:[#allocation10 + $0x28] sm:$0xff]  }
 0x434   :  { %v882_v38 = vpop.permute.xlu0 %881 }
 0x435   :  { %v887_v42 = vsel %vm693_vm3, %v882_v38, 0 }
 0x437   :  { %v3201_v37 = vpop.eup %3200 }
 0x438   :  { %v674_v24 = vmul.f32 %v3201_v37, %v3656_v53 }
 0x43a   :  { %v682_v39 = vpack.c.bf16 %v674_v24, %v674_v24 }
 0x43b   :  { %v3203_v40 = vpop.eup %3202 }
 0x43c   :  { %v675_v41 = vmul.f32 %v3203_v40, %v3660_v56  ;;  %2913 = vmatmul.mubr.msk.bf16.vlgmr.msra.gmra.mrb[16].mxu1 %vm197_vm2, %v682_v39 }
 0x43d   :  { %2923 = vmatpush3.bf16.msra.mxu1 %v887_v42  ;;  %2924 = vmatprep.mubr.msk.bf16.mxu1 %vm3406_vm0, %v3405_v0  ;;  %v3164_v42 = vld [vmem:[#allocation10 + $0x20] sm:$0xff]  }
 0x43e   :  { %v683_v21 = vpack.c.bf16 %v675_v41, %v675_v41  ;;  %2934 = vmatprep.subr.bf16.mxu1 %v3405_v0 }
 0x440   :  { %2919 = vmatmul.mubr.msk.bf16.vlgmr.msra.gmra.mrb[28].mxu0 %vm197_vm2, %v683_v21  ;;  %v97_v21 = vld [vmem:[#allocation7] sm:$0xff] }
 0x441   :  { %2929 = vmatpush3.bf16.msra.mxu0 %v935_v44  ;;  %2930 = vmatprep.mubr.msk.bf16.mxu0 %vm3406_vm0, %v3405_v0  ;;  %v98_v44 = vld [vmem:[#allocation7 + $0x8] sm:$0xff] }
 0x442   :  { %2940 = vmatprep.subr.bf16.mxu0 %v3405_v0 }
 0x461   :  { %v654_v45 = vpop.xlane.xlu1 %653 }
 0x462   :  { %3204 = vrcp.f32 %v654_v45  ;;  %v1211_v45 = vpack.c.bf16 %v98_v44, %v97_v21 }
 0x465   :  { %v660_v47 = vpop.xlane.xlu1 %659  ;;  %v657_v48 = vpop.xlane.xlu0 %656 }
 0x466   :  { %3206 = vrcp.f32 %v660_v47 }
 0x467   :  { %3208 = vrcp.f32 %v657_v48 }
 0x469   :  { %v663_v49 = vpop.xlane.xlu0 %662  ;;  %v1026_v55 = vpop.permute.xlu1 %1025 }
 0x46a   :  { %3210 = vrcp.f32 %v663_v49  ;;  %v1031_v58 = vsel %vm693_vm3, %v1026_v55, 0 }
 0x46c   :  { %v3205_v14 = vpop.eup %3204 }
 0x46d   :  { %v676_v18 = vmul.f32 %v3205_v14, %v3672_v20  ;;  %v978_v50 = vpop.permute.xlu0 %977 }
 0x46e   :  { %v983_v46 = vsel %vm693_vm3, %v978_v50, 0 }
 0x46f   :  { %v684_v11 = vpack.c.bf16 %v676_v18, %v676_v18 }
 0x470   :  { %v3207_v51 = vpop.eup %3206 }
 0x471   :  { %v3209_v52 = vpop.eup %3208  ;;  %2925 = vmatmul.mubr.msk.bf16.vlgmr.msra.gmra.mrb[20].mxu1 %vm197_vm2, %v684_v11  ;;  %v678_v54 = vmul.f32 %v3207_v51, %v3678_v15 }
 0x472   :  { %v677_v53 = vmul.f32 %v3209_v52, %v3674_v17  ;;  %2935 = vmatpush3.bf16.msra.mxu1 %v983_v46  ;;  %2936 = vmatprep.mubr.msk.bf16.mxu1 %vm3406_vm0, %v3405_v0 }
 0x473   :  { %2946 = vmatprep.subr.bf16.mxu1 %v3405_v0  ;;  %v686_v59 = vpack.c.bf16 %v678_v54, %v678_v54 }
 0x474   :  { %v685_v56 = vpack.c.bf16 %v677_v53, %v677_v53  ;;  %v3211_v57 = vpop.eup %3210 }
 0x475   :  { %v679_v60 = vmul.f32 %v3211_v57, %v3684_v25 }
 0x476   :  { %2931 = vmatmul.mubr.msk.bf16.vlgmr.msra.gmra.mrb[32].mxu0 %vm197_vm2, %v685_v56 }
 0x477   :  { %2941 = vmatpush3.bf16.msra.mxu0 %v1031_v58  ;;  %2942 = vmatprep.mubr.msk.bf16.mxu0 %vm3406_vm0, %v3405_v0  ;;  %v687_v61 = vpack.c.bf16 %v679_v60, %v679_v60  ;;  %v3162_v58 = vld [vmem:[#allocation10 + $0x30] sm:$0xff]   ;;  %v3163_v60 = vld [vmem:[#allocation10 + $0x38] sm:$0xff]  }
 0x478   :  { %2954 = vmatprep.subr.bf16.mxu0 %v3405_v0 }
 0x479   :  { %2937 = vmatmul.mubr.msk.bf16.vlgmr.msra.gmra.mrb[24].mxu1 %vm197_vm2, %v686_v59 }
 0x47a   :  { %2950 = vmatprep.mubr.msk.bf16.mxu1 %vm3406_vm0, %v3405_v0  ;;  %2947 = vmatpush3.bf16.msra.mxu1 %v3160_v22 }
 0x47b   :  { %2948 = vmatprep.subr.bf16.mxu1 %v3405_v0 }
 0x47e   :  { %2943 = vmatmul.mubr.msk.bf16.vlgmr.msra.gmra.mrb[36].mxu0 %vm197_vm2, %v687_v61  ;;  %2949 = vmatpush3.bf16.msra.mxu1 %v3161_v28  ;;  %v95_v61 = vld [vmem:[#allocation5] sm:$0xff] }
 0x47f   :  { %2958 = vmatprep.mubr.msk.bf16.mxu0 %vm3406_vm0, %v3405_v0  ;;  %2962 = vmatprep.subr.bf16.mxu1 %v3405_v0 }
 0x480   :  { %2955 = vmatpush3.bf16.msra.mxu0 %v3164_v42 }
 0x481   :  { %2956 = vmatprep.subr.bf16.mxu0 %v3405_v0 }
 0x484   :  { %2957 = vmatpush3.bf16.msra.mxu0 %v3165_v43 }
 0x485   :  { %2970 = vmatprep.subr.bf16.mxu0 %v3405_v0 }
 0x487   :  { %2959 = vmatmul.mubr.msk.bf16.vlgmr.msra.gmra.mrb[40].mxu0 %vm132_vm1, %v1211_v45 }
 0x488   :  { %2974 = vmatprep.mubr.msk.bf16.mxu0 %vm3406_vm0, %v3405_v0 }
 0x4ba   :  { %v3734_v62 = vpop.f32.mrb[12].mxu1 }
 0x4bb   :  { %v3736_v63 = vpop.f32.mrb[24].mxu0  ;;  %v2902_v1 = vpop.f32.mrb[13].mxu1 }
 0x4bc   :  { %v2908_v2 = vpop.f32.mrb[25].mxu0  ;;  %v734_v5 = vpop.f32.mrb[14].mxu1 }
 0x4bd   :  { %v782_v6 = vpop.f32.mrb[26].mxu0  ;;  %v2903_v7 = vpop.f32.mrb[15].mxu1  ;;  %v2682_v5 = vld [vmem:[%s4036_s5] ss:$0 sm:$0xff] }
 0x4be   :  { %v2909_v8 = vpop.f32.mrb[27].mxu0 }
 0x50f   :  { %v827_v9 = vpop.f32.mrb[16].mxu1 }
 0x510   :  { %v2914_v12 = vpop.f32.mrb[17].mxu1 }
 0x511   :  { %v830_v20 = vpop.f32.mrb[18].mxu1 }
 0x512   :  { %v2915_v17 = vpop.f32.mrb[19].mxu1 }
 0x513   :  { %v875_v13 = vpop.f32.mrb[28].mxu0 }
 0x514   :  { %v3128_v10 = vpack.i.bf16 %v875_v13, %v827_v9  ;;  %v2920_v15 = vpop.f32.mrb[29].mxu0 }
 0x515   :  { %v878_v16 = vpop.f32.mrb[30].mxu0 }
 0x516   :  { %3129 = vrot.lane.b32.xlu0 %v3128_v10, %s3399_s10  ;;  %v2921_v19 = vpop.f32.mrb[31].mxu0 }
 0x544   :  { %v923_v23 = vpop.f32.mrb[20].mxu1 }
 0x545   :  { %v2926_v25 = vpop.f32.mrb[21].mxu1 }
 0x546   :  { %v926_v26 = vpop.f32.mrb[22].mxu1 }
 0x547   :  { %v2927_v27 = vpop.f32.mrb[23].mxu1 }
 0x549   :  { %v971_v29 = vpop.f32.mrb[32].mxu0 }
 0x54a   :  { %v3133_v30 = vpack.i.bf16 %v971_v29, %v923_v23  ;;  %v2932_v31 = vpop.f32.mrb[33].mxu0 }
 0x54b   :  { %v974_v32 = vpop.f32.mrb[34].mxu0 }
 0x54c   :  { %3134 = vrot.lane.b32.xlu1 %v3133_v30, %s3411_s14  ;;  %v2933_v33 = vpop.f32.mrb[35].mxu0  ;;  %v1019_v34 = vpop.f32.mrb[24].mxu1 }
 0x54d   :  { %v2938_v35 = vpop.f32.mrb[25].mxu1 }
 0x54e   :  { %v1022_v36 = vpop.f32.mrb[26].mxu1 }
 0x54f   :  { %v2939_v37 = vpop.f32.mrb[27].mxu1 }
 0x551   :  { %v1067_v24 = vpop.f32.mrb[36].mxu0 }
 0x552   :  { %v3138_v38 = vpack.i.bf16 %v1067_v24, %v1019_v34  ;;  %v2944_v39 = vpop.f32.mrb[37].mxu0 }
 0x553   :  { %v1070_v40 = vpop.f32.mrb[38].mxu0  ;;  %v3166_v39 = vld [vmem:[#allocation10 + $0x40] sm:$0xff]  }
 0x554   :  { %3139 = vrot.lane.b32.xlu0 %v3138_v38, %s3412_s15  ;;  %v2945_v41 = vpop.f32.mrb[39].mxu0  ;;  %2971 = vmatpush3.bf16.msra.mxu0 %v3166_v39  ;;  %v3167_v40 = vld [vmem:[#allocation10 + $0x48] sm:$0xff]  }
 0x555   :  { %2972 = vmatprep.subr.bf16.mxu0 %v3405_v0 }
 0x558   :  { %2973 = vmatpush3.bf16.msra.mxu0 %v3167_v40 }
 0x559   :  { %2984 = vmatprep.subr.bf16.mxu0 %v3405_v0 }
 0x55a   :  { %v1265_v1 = vpop.f32.mrb[40].mxu0 }
 0x55b   :  { %v2960_v2 = vpop.f32.mrb[41].mxu0  ;;  %v2742_v25 = vpack.c.bf16 %v1265_v1, %v1265_v1 }
 0x55c   :  { %v1268_v26 = vpop.f32.mrb[42].mxu0 }
 0x55d   :  { %v2961_v27 = vpop.f32.mrb[43].mxu0  ;;  %v3783_v38 = vpack.c.bf16 %v1268_v26, %v1268_v26 }
 0x588   :  { %v3130_v47 = vpop.permute.xlu0 %3129 }
 0x589   :  { %v3132_v49 = vunpack.i.h.bf16 %v3130_v47  ;;  %v3131_v14 = vunpack.i.l.bf16 %v3130_v47 }
 0x58b   :  { %v1098_v51 = vsel %vm197_vm2, %v3736_v63, %v3132_v49  ;;  %v1097_v52 = vsel %vm197_vm2, %v3734_v62, %v3131_v14  ;;  %v96_v62 = vld [vmem:[#allocation5 + $0x8] sm:$0xff] }
 0x58c   :  { %v1272_v63 = vpack.c.bf16 %v96_v62, %v95_v61  ;;  %v2687_v61 = vld [vmem:[%s4036_s5 + $0x2] ss:$0 sm:$0xff] }
 0x5be   :  { %v3135_v48 = vpop.permute.xlu1 %3134 }
 0x5bf   :  { %v3137_v18 = vunpack.i.h.bf16 %v3135_v48  ;;  %v3136_v50 = vunpack.i.l.bf16 %v3135_v48 }
 0x5c1   :  { %v1101_v54 = vsel %vm1099_vm6, %v1098_v51, %v3137_v18  ;;  %v1100_v55 = vsel %vm1099_vm6, %v1097_v52, %v3136_v50 }
 0x5c6   :  { %v3140_v11 = vpop.permute.xlu0 %3139 }
 0x5c7   :  { %v3142_v46 = vunpack.i.h.bf16 %v3140_v11  ;;  %v3141_v53 = vunpack.i.l.bf16 %v3140_v11 }
 0x5c9   :  { %v1104_v56 = vsel %vm1102_vm7, %v1101_v54, %v3142_v46  ;;  %v1103_v57 = vsel %vm1102_vm7, %v1100_v55, %v3141_v53  ;;  %v2686_v54 = vld [vmem:[%s4036_s5 + $0x1] ss:$0 sm:$0xff] }
 0x5ca   :  { %v1105_v59 = vpack.c.bf16 %v1104_v56, %v1103_v57 }
 0x5cc   :  { %2951 = vmatmul.mubr.msk.bf16.vlgmr.msra.gmra.mrb[28].mxu1 %vm132_vm1, %v1105_v59 }
 0x5cd   :  { %2963 = vmatpush3.bf16.msra.mxu1 %v3162_v58  ;;  %2966 = vmatprep.mubr.msk.bf16.mxu1 %vm3406_vm0, %v3405_v0 }
 0x5ce   :  { %2964 = vmatprep.subr.bf16.mxu1 %v3405_v0 }
 0x5d1   :  { %2965 = vmatpush3.bf16.msra.mxu1 %v3163_v60 }
 0x5d2   :  { %2978 = vmatprep.subr.bf16.mxu1 %v3405_v0 }
 0x5d4   :  { %2967 = vmatmul.mubr.msk.bf16.vlgmr.msra.gmra.mrb[32].mxu1 %vm132_vm1, %v1272_v63 }
 0x5d5   :  { %2980 = vmatprep.mubr.msk.bf16.mxu1 %vm3406_vm0, %v3405_v0 }
 0x69f   :  { %v1163_v6 = vpop.f32.mrb[28].mxu1 }
 0x6a0   :  { %v1164_v7 = vadd.f32 %v2682_v5, %v1163_v6  ;;  %v2952_v8 = vpop.f32.mrb[29].mxu1 }
 0x6a1   :  { %v1166_v9 = vpop.f32.mrb[30].mxu1 }
 0x6a2   :  { %v1167_v12 = vadd.f32 %v2682_v5, %v1166_v9  ;;  %v2953_v20 = vpop.f32.mrb[31].mxu1  ;;  %v1170_v17 = vadd.f32 %v1164_v7, %v3543_v3 }
 0x6a4   :  { %v1172_v13 = vsel %vm132_vm1, %v1170_v17, 0.0  ;;  %v1171_v10 = vadd.f32 %v1167_v12, %v3545_v4 }
 0x6a5   :  { %1173 = vadd.xlane.f32.xlu1 %v1172_v13 }
 0x6a6   :  { %v1175_v15 = vsel %vm132_vm1, %v1171_v10, 0.0 }
 0x6a7   :  { %1176 = vadd.xlane.f32.xlu0 %v1175_v15  ;;  %v1326_v16 = vpop.f32.mrb[32].mxu1 }
 0x6a8   :  { %v2744_v19 = vpack.c.bf16 %v1326_v16, %v1326_v16  ;;  %v2968_v22 = vpop.f32.mrb[33].mxu1 }
 0x6a9   :  { %v1329_v3 = vpop.f32.mrb[34].mxu1 }
 0x6aa   :  { %v1452_v23 = vsel %vm197_vm2, %v2744_v19, 0  ;;  %v2969_v4 = vpop.f32.mrb[35].mxu1  ;;  %v3778_v24 = vpack.c.bf16 %v1329_v3, %v1329_v3 }
 0x6ab   :  { %2979 = vmatpush3.bf16.xpose.msra.mxu1 %v1452_v23 }
 0x6ac   :  { %2990 = vmatprep.subr.bf16.mxu1 %v3405_v0  ;;  %v1498_v7 = vsel %vm197_vm2, %v3778_v24, 0 }
 0x6b2   :  { %2981 = vmatmul.mubr.msk.bf16.vlgmr.msra.gmra.mrb[36].mxu1 %vm197_vm2, %v2742_v25 }
 0x6b3   :  { %2992 = vmatprep.mubr.msk.bf16.mxu1 %vm3406_vm0, %v3405_v0 }
 0x732   :  { %v1174_v28 = vpop.xlane.xlu1 %1173 }
 0x733   :  { %v1179_v29 = vmul.f32 0.03125, %v1174_v28 }
 0x734   :  { %v1177_v30 = vpop.xlane.xlu0 %1176 }
 0x735   :  { %v1181_v31 = vsub.f32 %v1170_v17, %v1179_v29  ;;  %v1180_v32 = vmul.f32 0.03125, %v1177_v30 }
 0x737   :  { %v1182_v33 = vsub.f32 %v1171_v10, %v1180_v32  ;;  %v1183_v34 = vmul.f32 %v1181_v31, %v1181_v31 }
 0x739   :  { %v1185_v35 = vsel %vm132_vm1, %v1183_v34, 0.0  ;;  %v1184_v36 = vmul.f32 %v1182_v33, %v1182_v33 }
 0x73a   :  { %1186 = vadd.xlane.f32.xlu0 %v1185_v35 }
 0x73b   :  { %v1188_v37 = vsel %vm132_vm1, %v1184_v36, 0.0 }
 0x73c   :  { %1189 = vadd.xlane.f32.xlu1 %v1188_v37 }
 0x74d   :  { %1426 = vrot.lane.b32.xlu1 %v3778_v24, %s3408_s24 }
 0x750   :  { %1424 = vrot.lane.b32.xlu0 %v2744_v19, %s3408_s24 }
 0x751   :  { %1412 = vrot.lane.b32.xlu1 %v2742_v25, %s3408_s24 }
 0x754   :  { %1414 = vrot.lane.b32.xlu0 %v3783_v38, %s3408_s24 }
 0x755   :  { %1428 = vrot.lane.b32.xlu1 %v2744_v19, %s3407_s4 }
 0x758   :  { %1430 = vrot.lane.b32.xlu0 %v3778_v24, %s3407_s4 }
 0x759   :  { %1416 = vrot.lane.b32.xlu1 %v2742_v25, %s3407_s4 }
 0x75c   :  { %1418 = vrot.lane.b32.xlu0 %v3783_v38, %s3407_s4 }
 0x75d   :  { %1432 = vrot.lane.b32.xlu1 %v2744_v19, %s3409_s12 }
 0x760   :  { %1434 = vrot.lane.b32.xlu0 %v3778_v24, %s3409_s12 }
 0x761   :  { %1420 = vrot.lane.b32.xlu1 %v2742_v25, %s3409_s12 }
 0x764   :  { %1422 = vrot.lane.b32.xlu0 %v3783_v38, %s3409_s12 }
 0x785   :  { %v3802_v41 = vpop.f32.mrb[36].mxu1 }
 0x786   :  { %v1816_v42 = vsel %vm197_vm2, %v3802_v41, -inf  ;;  %v2982_v43 = vpop.f32.mrb[37].mxu1 }
 0x787   :  { %1817 = vmax.xlane.f32.xlu1 %v1816_v42  ;;  %v1491_v21 = vpop.f32.mrb[38].mxu1 }
 0x788   :  { %v2983_v44 = vpop.f32.mrb[39].mxu1 }
 0x7c7   :  { %v1187_v45 = vpop.xlane.xlu0 %1186 }
 0x7c8   :  { %v1191_v47 = vmul.f32 0.03125, %v1187_v45 }
 0x7c9   :  { %v1190_v48 = vpop.xlane.xlu1 %1189 }
 0x7ca   :  { %v1193_v49 = vadd.f32 1e-05, %v1191_v47  ;;  %v1192_v14 = vmul.f32 0.03125, %v1190_v48 }
 0x7cb   :  { %v1425_v18 = vpop.permute.xlu0 %1424 }
 0x7cc   :  { %3212 = vrsqrt.f32 %v1193_v49  ;;  %v1194_v50 = vadd.f32 1e-05, %v1192_v14  ;;  %v1544_v11 = vsel %vm197_vm2, %v1425_v18, 0 }
 0x7cd   :  { %v1427_v51 = vpop.permute.xlu1 %1426  ;;  %2991 = vmatpush3.bf16.xpose.msra.mxu1 %v1544_v11 }
 0x7ce   :  { %3214 = vrsqrt.f32 %v1194_v50  ;;  %3002 = vmatprep.subr.bf16.mxu1 %v3405_v0  ;;  %v1590_v12 = vsel %vm197_vm2, %v1427_v51, 0 }
 0x7cf   :  { %v1415_v8 = vpop.permute.xlu0 %1414 }
 0x7d1   :  { %v1413_v52 = vpop.permute.xlu1 %1412 }
 0x7d3   :  { %v1431_v20 = vpop.permute.xlu0 %1430 }
 0x7d4   :  { %2993 = vmatmul.mubr.msk.bf16.vlgmr.msra.gmra.mrb[40].mxu1 %vm197_vm2, %v1413_v52  ;;  %v1682_v13 = vsel %vm197_vm2, %v1431_v20, 0 }
 0x7d5   :  { %v1429_v46 = vpop.permute.xlu1 %1428  ;;  %3004 = vmatprep.mubr.msk.bf16.mxu1 %vm3406_vm0, %v3405_v0 }
 0x7d6   :  { %v3213_v53 = vpop.eup %3212  ;;  %v1636_v55 = vsel %vm197_vm2, %v1429_v46, 0 }
 0x7d7   :  { %v1197_v56 = vmul.f32 %v3213_v53, %v1181_v31  ;;  %3003 = vmatpush3.bf16.xpose.msra.mxu1 %v1636_v55  ;;  %v1419_v17 = vpop.permute.xlu0 %1418 }
 0x7d8   :  { %v3215_v57 = vpop.eup %3214  ;;  %3014 = vmatprep.subr.bf16.mxu1 %v3405_v0 }
 0x7d9   :  { %v1203_v58 = vmul.f32 %v2686_v54, %v1197_v56  ;;  %v1198_v59 = vmul.f32 %v3215_v57, %v1182_v33  ;;  %v1417_v60 = vpop.permute.xlu1 %1416 }
 0x7db   :  { %v1204_v62 = vmul.f32 %v2686_v54, %v1198_v59  ;;  %v3819_v63 = vadd.f32 %v2687_v61, %v1203_v58  ;;  %v1435_v10 = vpop.permute.xlu0 %1434 }
 0x7dc   :  { %v1774_v15 = vsel %vm197_vm2, %v1435_v10, 0 }
 0x7dd   :  { %v3821_v1 = vadd.f32 %v2687_v61, %v1204_v62  ;;  %v1433_v2 = vpop.permute.xlu1 %1432 }
 0x7de   :  { %v1728_v5 = vsel %vm197_vm2, %v1433_v2, 0  ;;  %3005 = vmatmul.mubr.msk.bf16.vlgmr.msra.gmra.mrb[44].mxu1 %vm197_vm2, %v1417_v60 }
 0x7df   :  { %v1333_v6 = vpack.c.bf16 %v3821_v1, %v3819_v63  ;;  %3015 = vmatpush3.bf16.xpose.msra.mxu1 %v1728_v5  ;;  %3016 = vmatprep.mubr.msk.bf16.mxu1 %vm3406_vm0, %v3405_v0  ;;  %v1423_v16 = vpop.permute.xlu0 %1422 }
 0x7e0   :  { %3026 = vmatprep.subr.bf16.mxu1 %v3405_v0 }
 0x7e1   :  { %2975 = vmatmul.mubr.msk.bf16.vlgmr.msra.gmra.mrb[44].mxu0 %vm132_vm1, %v1333_v6  ;;  %v1421_v9 = vpop.permute.xlu1 %1420 }
 0x7e2   :  { %2985 = vmatpush3.bf16.xpose.msra.mxu0 %v1498_v7  ;;  %2986 = vmatprep.mubr.msk.bf16.mxu0 %vm3406_vm0, %v3405_v0 }
 0x7e3   :  { %2996 = vmatprep.subr.bf16.mxu0 %v3405_v0 }
 0x7e6   :  { %3017 = vmatmul.mubr.msk.bf16.vlgmr.msra.gmra.mrb[48].mxu1 %vm197_vm2, %v1421_v9 }
 0x7e7   :  { %3028 = vmatprep.mubr.msk.bf16.mxu1 %vm3406_vm0, %v3405_v0 }
 0x7e9   :  { %2987 = vmatmul.mubr.msk.bf16.vlgmr.msra.gmra.mrb[48].mxu0 %vm197_vm2, %v3783_v38 }
 0x7ea   :  { %2997 = vmatpush3.bf16.xpose.msra.mxu0 %v1590_v12  ;;  %2998 = vmatprep.mubr.msk.bf16.mxu0 %vm3406_vm0, %v3405_v0 }
 0x7eb   :  { %3008 = vmatprep.subr.bf16.mxu0 %v3405_v0 }
 0x7f1   :  { %2999 = vmatmul.mubr.msk.bf16.vlgmr.msra.gmra.mrb[52].mxu0 %vm197_vm2, %v1415_v8 }
 0x7f2   :  { %3009 = vmatpush3.bf16.xpose.msra.mxu0 %v1682_v13  ;;  %3010 = vmatprep.mubr.msk.bf16.mxu0 %vm3406_vm0, %v3405_v0 }
 0x7f3   :  { %3020 = vmatprep.subr.bf16.mxu0 %v3405_v0 }
 0x7f9   :  { %3011 = vmatmul.mubr.msk.bf16.vlgmr.msra.gmra.mrb[56].mxu0 %vm197_vm2, %v1419_v17 }
 0x7fa   :  { %3021 = vmatpush3.bf16.xpose.msra.mxu0 %v1774_v15  ;;  %3022 = vmatprep.mubr.msk.bf16.mxu0 %vm3406_vm0, %v3405_v0 }
 0x7fb   :  { %3032 = vmatprep.subr.bf16.mxu0 %v3405_v0 }
 0x801   :  { %3023 = vmatmul.mubr.msk.bf16.vlgmr.msra.gmra.mrb[60].mxu0 %vm197_vm2, %v1423_v16 }
 0x802   :  { %3034 = vmatprep.mubr.msk.bf16.mxu0 %vm3406_vm0, %v3405_v0 }
 0x814   :  { %v1818_v29 = vpop.xlane.xlu1 %1817 }
 0x815   :  { %v1840_v36 = vsub.f32 %v3802_v41, %v1818_v29 }
 0x817   :  { %v1848_v40 = vmul.f32 1.442695, %v1840_v36 }
 0x819   :  { %3216 = vpow2.f32 %v1848_v40 }
 0x823   :  { %v3217_v52 = vpop.eup %3216 }
 0x824   :  { %v1864_v53 = vsel %vm197_vm2, %v3217_v52, 0.0 }
 0x8a7   :  { %v3858_v19 = vpop.f32.mrb[40].mxu1 }
 0x8a8   :  { %v2994_v22 = vpop.f32.mrb[41].mxu1  ;;  %v1822_v47 = vsel %vm197_vm2, %v3858_v19, -inf }
 0x8a9   :  { %v1583_v23 = vpop.f32.mrb[42].mxu1 }
 0x8aa   :  { %v2995_v25 = vpop.f32.mrb[43].mxu1 }
 0x8b1   :  { %v3860_v3 = vpop.f32.mrb[44].mxu1 }
 0x8b2   :  { %v3006_v4 = vpop.f32.mrb[45].mxu1  ;;  %v1828_v48 = vsel %vm197_vm2, %v3860_v3, -inf }
 0x8b3   :  { %v1675_v26 = vpop.f32.mrb[46].mxu1 }
 0x8b4   :  { %v1387_v27 = vpop.f32.mrb[44].mxu0  ;;  %v3007_v28 = vpop.f32.mrb[47].mxu1 }
 0x8b5   :  { %v3862_v30 = vpack.c.bf16 %v1387_v27, %v1387_v27  ;;  %v2976_v31 = vpop.f32.mrb[45].mxu0 }
 0x8b6   :  { %v1390_v32 = vpop.f32.mrb[46].mxu0 }
 0x8b7   :  { %v3864_v33 = vpack.c.bf16 %v1390_v32, %v1390_v32  ;;  %v2977_v34 = vpop.f32.mrb[47].mxu0  ;;  %v1916_v35 = vsel %vm693_vm3, %v3862_v30, 0 }
 0x8b8   :  { %3027 = vmatpush3.bf16.msra.mxu1 %v1916_v35 }
 0x8b9   :  { %v1962_v37 = vsel %vm693_vm3, %v3864_v33, 0  ;;  %v1764_v24 = vpop.f32.mrb[48].mxu1  ;;  %3038 = vmatprep.subr.bf16.mxu1 %v3405_v0 }
 0x8ba   :  { %3033 = vmatpush3.bf16.msra.mxu0 %v1962_v37  ;;  %v3018_v38 = vpop.f32.mrb[49].mxu1  ;;  %v1834_v11 = vsel %vm197_vm2, %v1764_v24, -inf }
 0x8bb   :  { %v1767_v39 = vpop.f32.mrb[50].mxu1  ;;  %3044 = vmatprep.subr.bf16.mxu0 %v3405_v0 }
 0x8bc   :  { %v1534_v42 = vpop.f32.mrb[48].mxu0  ;;  %v3019_v43 = vpop.f32.mrb[51].mxu1 }
 0x8bd   :  { %v2988_v21 = vpop.f32.mrb[49].mxu0  ;;  %v1819_v44 = vsel %vm197_vm2, %v1534_v42, -inf }
 0x8be   :  { %1820 = vmax.xlane.f32.xlu0 %v1819_v44  ;;  %v1537_v41 = vpop.f32.mrb[50].mxu0 }
 0x8bf   :  { %v2989_v45 = vpop.f32.mrb[51].mxu0 }
 0x8c2   :  { %1823 = vmax.xlane.f32.xlu0 %v1822_v47 }
 0x8c4   :  { %v3878_v49 = vpop.f32.mrb[52].mxu0 }
 0x8c5   :  { %v1825_v14 = vsel %vm197_vm2, %v3878_v49, -inf  ;;  %v3000_v18 = vpop.f32.mrb[53].mxu0 }
 0x8c6   :  { %1829 = vmax.xlane.f32.xlu0 %v1828_v48  ;;  %1826 = vmax.xlane.f32.xlu1 %v1825_v14  ;;  %v1629_v50 = vpop.f32.mrb[54].mxu0 }
 0x8c7   :  { %v3001_v51 = vpop.f32.mrb[55].mxu0 }
 0x8ca   :  { %1835 = vmax.xlane.f32.xlu0 %v1834_v11 }
 0x8cc   :  { %v1718_v46 = vpop.f32.mrb[56].mxu0 }
 0x8cd   :  { %v1831_v54 = vsel %vm197_vm2, %v1718_v46, -inf  ;;  %v3012_v55 = vpop.f32.mrb[57].mxu0 }
 0x8ce   :  { %1865 = vadd.xlane.f32.xlu0 %v1864_v53  ;;  %1832 = vmax.xlane.f32.xlu1 %v1831_v54  ;;  %v1721_v56 = vpop.f32.mrb[58].mxu0 }
 0x8cf   :  { %v3013_v57 = vpop.f32.mrb[59].mxu0 }
 0x8d4   :  { %v1810_v58 = vpop.f32.mrb[60].mxu0 }
 0x8d5   :  { %v1837_v59 = vsel %vm197_vm2, %v1810_v58, -inf  ;;  %v3024_v60 = vpop.f32.mrb[61].mxu0 }
 0x8d6   :  { %1838 = vmax.xlane.f32.xlu1 %v1837_v59  ;;  %v1813_v61 = vpop.f32.mrb[62].mxu0 }
 0x8d7   :  { %v3025_v62 = vpop.f32.mrb[63].mxu0 }
 0x8e7   :  { %1438 = vrot.lane.b32.xlu1 %v3864_v33, %s3408_s24 }
 0x94b   :  { %v1821_v2 = vpop.xlane.xlu0 %1820 }
 0x94c   :  { %v1841_v5 = vsub.f32 %v1534_v42, %v1821_v2 }
 0x94e   :  { %v1850_v6 = vmul.f32 1.442695, %v1841_v5 }
 0x94f   :  { %v1824_v7 = vpop.xlane.xlu0 %1823 }
 0x950   :  { %3218 = vpow2.f32 %v1850_v6  ;;  %v1842_v8 = vsub.f32 %v3858_v19, %v1824_v7 }
 0x952   :  { %v1852_v9 = vmul.f32 1.442695, %v1842_v8 }
 0x953   :  { %v1830_v12 = vpop.xlane.xlu0 %1829  ;;  %v1827_v32 = vpop.xlane.xlu1 %1826 }
 0x954   :  { %3220 = vpow2.f32 %v1852_v9  ;;  %v1844_v20 = vsub.f32 %v3860_v3, %v1830_v12  ;;  %v1843_v34 = vsub.f32 %v3878_v49, %v1827_v32 }
 0x956   :  { %v1856_v17 = vmul.f32 1.442695, %v1844_v20  ;;  %v1854_v36 = vmul.f32 1.442695, %v1843_v34 }
 0x957   :  { %v1836_v13 = vpop.xlane.xlu0 %1835 }
 0x958   :  { %3222 = vpow2.f32 %v1856_v17  ;;  %v1846_v10 = vsub.f32 %v1764_v24, %v1836_v13 }
 0x95a   :  { %v3219_v15 = vpop.eup %3218  ;;  %v1860_v16 = vmul.f32 1.442695, %v1846_v10 }
 0x95b   :  { %v1866_v22 = vpop.xlane.xlu0 %1865  ;;  %v1867_v23 = vsel %vm197_vm2, %v3219_v15, 0.0  ;;  %v1833_v35 = vpop.xlane.xlu1 %1832 }
 0x95c   :  { %3224 = vpow2.f32 %v1860_v16  ;;  %1868 = vadd.xlane.f32.xlu1 %v1867_v23  ;;  %v1845_v37 = vsub.f32 %v1718_v46, %v1833_v35 }
 0x95d   :  { %3226 = vrcp.f32 %v1866_v22 }
 0x95e   :  { %v3221_v25 = vpop.eup %3220  ;;  %3228 = vpow2.f32 %v1854_v36  ;;  %v1858_v38 = vmul.f32 1.442695, %v1845_v37 }
 0x95f   :  { %v1870_v19 = vsel %vm197_vm2, %v3221_v25, 0.0 }
 0x960   :  { %1871 = vadd.xlane.f32.xlu0 %v1870_v19  ;;  %3230 = vpow2.f32 %v1858_v38 }
 0x962   :  { %v3892_v4 = vpop.eup %3222 }
 0x963   :  { %v1876_v3 = vsel %vm197_vm2, %v3892_v4, 0.0  ;;  %v1839_v24 = vpop.xlane.xlu1 %1838 }
 0x964   :  { %1877 = vadd.xlane.f32.xlu0 %v1876_v3  ;;  %v1847_v39 = vsub.f32 %v1810_v58, %v1839_v24 }
 0x966   :  { %v3896_v26 = vpop.eup %3224  ;;  %v1862_v40 = vmul.f32 1.442695, %v1847_v39 }
 0x967   :  { %v3227_v27 = vpop.eup %3226  ;;  %v1882_v28 = vsel %vm197_vm2, %v3896_v26, 0.0 }
 0x968   :  { %v1896_v29 = vmul.f32 %v3227_v27, %v3217_v52  ;;  %1883 = vadd.xlane.f32.xlu0 %v1882_v28  ;;  %3232 = vpow2.f32 %v1862_v40  ;;  %v3229_v42 = vpop.eup %3228 }
 0x969   :  { %v1873_v43 = vsel %vm197_vm2, %v3229_v42, 0.0 }
 0x96a   :  { %v1904_v31 = vpack.c.bf16 %v1896_v29, %v1896_v29  ;;  %v3913_v21 = vpop.eup %3230 }
 0x96b   :  { %v1879_v44 = vsel %vm197_vm2, %v3913_v21, 0.0 }
 0x96c   :  { %3029 = vmatmul.mubr.msk.bf16.vlgmr.msra.gmra.mrb[52].mxu1 %vm197_vm2, %v1904_v31 }
 0x96d   :  { %1440 = vrot.lane.b32.xlu1 %v3862_v30, %s3407_s4  ;;  %3040 = vmatprep.mubr.msk.bf16.mxu1 %vm3406_vm0, %v3405_v0 }
 0x972   :  { %v3917_v41 = vpop.eup %3232 }
 0x973   :  { %v1885_v45 = vsel %vm197_vm2, %v3917_v41, 0.0 }
 0x97e   :  { %1436 = vrot.lane.b32.xlu0 %v3862_v30, %s3408_s24 }
 0x982   :  { %1442 = vrot.lane.b32.xlu0 %v3864_v33, %s3407_s4  ;;  %s2641_s4 = sshll.u32 %s3413_s3, 4  ;;  %s2642_s4 = int_to_ptr.vmem [resolvable:$true] %s2641_s4 }
 0x983   :  { %s3366_s24 = scalar_lea.vmem %s2642_s4, 256  ;;  %p3371_p13 = scmp.lt.s32.totalorder %s2642_s4, %s2642_s4 }
 0x984   :  { %p3367_p12 = scmp.ne.s32.totalorder %s2642_s4, %s3366_s24  ;;  %p3372_p0 = scmp.lt.s32.totalorder %s3366_s24, %s3366_s24 }
 0x986   :  { %1446 = vrot.lane.b32.xlu0 %v3864_v33, %s3409_s12  ;;  %v1439_v33 = vpop.permute.xlu1 %1438  ;;  %p3373_p1 = por %p3372_p0, %p3371_p13 }
 0x987   :  { %v2054_v52 = vsel %vm693_vm3, %v1439_v33, 0 }
 0x988   :  { %p3374_p2 = pnand %p3373_p1, %p3367_p12 }
 0x991   :  { %1874 = vadd.xlane.f32.xlu1 %v1873_v43 }
 0x995   :  { %1880 = vadd.xlane.f32.xlu1 %v1879_v44 }
 0x999   :  { %1886 = vadd.xlane.f32.xlu1 %v1885_v45 }
 0x9aa   :  { %1444 = vrot.lane.b32.xlu1 %v3862_v30, %s3409_s12 }
 0x9e9   :  { %v1869_v47 = vpop.xlane.xlu1 %1868 }
 0x9ea   :  { %3234 = vrcp.f32 %v1869_v47 }
 0x9ed   :  { %v1872_v48 = vpop.xlane.xlu0 %1871  ;;  %v1441_v54 = vpop.permute.xlu1 %1440 }
 0x9ee   :  { %3236 = vrcp.f32 %v1872_v48  ;;  %v2100_v57 = vsel %vm693_vm3, %v1441_v54, 0 }
 0x9f1   :  { %v1878_v49 = vpop.xlane.xlu0 %1877 }
 0x9f2   :  { %3238 = vrcp.f32 %v1878_v49 }
 0x9f4   :  { %v3235_v14 = vpop.eup %3234 }
 0x9f5   :  { %v1897_v18 = vmul.f32 %v3235_v14, %v3219_v15  ;;  %v1884_v50 = vpop.xlane.xlu0 %1883 }
 0x9f6   :  { %3240 = vrcp.f32 %v1884_v50 }
 0x9f7   :  { %v1905_v11 = vpack.c.bf16 %v1897_v18, %v1897_v18  ;;  %v3169_v18 = vld [vmem:[#allocation10 + $0x58] sm:$0xff]  }
 0x9f8   :  { %v3237_v51 = vpop.eup %3236 }
 0x9f9   :  { %v1898_v46 = vmul.f32 %v3237_v51, %v3221_v25  ;;  %v1437_v53 = vpop.permute.xlu0 %1436  ;;  %3035 = vmatmul.mubr.msk.bf16.vlgmr.msra.gmra.mrb[64].mxu0 %vm197_vm2, %v1905_v11 }
 0x9fa   :  { %v2008_v30 = vsel %vm693_vm3, %v1437_v53, 0  ;;  %3045 = vmatpush3.bf16.msra.mxu0 %v2054_v52  ;;  %3046 = vmatprep.mubr.msk.bf16.mxu0 %vm3406_vm0, %v3405_v0 }
 0x9fb   :  { %3039 = vmatpush3.bf16.msra.mxu1 %v2008_v30  ;;  %v1906_v55 = vpack.c.bf16 %v1898_v46, %v1898_v46  ;;  %3056 = vmatprep.subr.bf16.mxu0 %v3405_v0 }
 0x9fc   :  { %3050 = vmatprep.subr.bf16.mxu1 %v3405_v0  ;;  %v3239_v56 = vpop.eup %3238 }
 0x9fd   :  { %v1900_v58 = vmul.f32 %v3239_v56, %v3892_v4  ;;  %v1443_v9 = vpop.permute.xlu0 %1442 }
 0x9fe   :  { %3041 = vmatmul.mubr.msk.bf16.vlgmr.msra.gmra.mrb[56].mxu1 %vm197_vm2, %v1906_v55  ;;  %v2146_v10 = vsel %vm693_vm3, %v1443_v9, 0 }
 0x9ff   :  { %3051 = vmatpush3.bf16.msra.mxu1 %v2100_v57  ;;  %3052 = vmatprep.mubr.msk.bf16.mxu1 %vm3406_vm0, %v3405_v0  ;;  %v1908_v59 = vpack.c.bf16 %v1900_v58, %v1900_v58 }
 0xa00   :  { %3062 = vmatprep.subr.bf16.mxu1 %v3405_v0  ;;  %v3241_v62 = vpop.eup %3240 }
 0xa01   :  { %v1902_v6 = vmul.f32 %v3241_v62, %v3896_v26  ;;  %v1447_v16 = vpop.permute.xlu0 %1446 }
 0xa02   :  { %v2238_v25 = vsel %vm693_vm3, %v1447_v16, 0 }
 0xa03   :  { %v1910_v13 = vpack.c.bf16 %v1902_v6, %v1902_v6 }
 0xa06   :  { %3053 = vmatmul.mubr.msk.bf16.vlgmr.msra.gmra.mrb[60].mxu1 %vm197_vm2, %v1908_v59 }
 0xa07   :  { %3064 = vmatprep.mubr.msk.bf16.mxu1 %vm3406_vm0, %v3405_v0 }
 0xa1e   :  { %v1875_v60 = vpop.xlane.xlu1 %1874 }
 0xa1f   :  { %3242 = vrcp.f32 %v1875_v60 }
 0xa22   :  { %v1881_v61 = vpop.xlane.xlu1 %1880 }
 0xa23   :  { %3244 = vrcp.f32 %v1881_v61 }
 0xa26   :  { %v1887_v2 = vpop.xlane.xlu1 %1886 }
 0xa27   :  { %3246 = vrcp.f32 %v1887_v2 }
 0xa29   :  { %v3243_v5 = vpop.eup %3242 }
 0xa2a   :  { %v1899_v7 = vmul.f32 %v3243_v5, %v3229_v42  ;;  %v1445_v8 = vpop.permute.xlu1 %1444 }
 0xa2b   :  { %v2192_v12 = vsel %vm693_vm3, %v1445_v8, 0 }
 0xa2c   :  { %3063 = vmatpush3.bf16.msra.mxu1 %v2192_v12  ;;  %v1907_v20 = vpack.c.bf16 %v1899_v7, %v1899_v7 }
 0xa2d   :  { %v3245_v17 = vpop.eup %3244  ;;  %3074 = vmatprep.subr.bf16.mxu1 %v3405_v0 }
 0xa2e   :  { %3047 = vmatmul.mubr.msk.bf16.vlgmr.msra.gmra.mrb[68].mxu0 %vm197_vm2, %v1907_v20  ;;  %v1901_v15 = vmul.f32 %v3245_v17, %v3913_v21  ;;  %v3168_v21 = vld [vmem:[#allocation10 + $0x50] sm:$0xff]  }
 0xa2f   :  { %3057 = vmatpush3.bf16.msra.mxu0 %v2146_v10  ;;  %3065 = vmatmul.mubr.msk.bf16.vlgmr.msra.gmra.mrb[64].mxu1 %vm197_vm2, %v1910_v13  ;;  %v2719_v10 = vld [vmem:[%s4036_s5 + $0x3] ss:$0 sm:$0xff] }
 0xa30   :  { %3058 = vmatprep.mubr.msk.bf16.mxu0 %vm3406_vm0, %v3405_v0  ;;  %3068 = vmatprep.subr.bf16.mxu0 %v3405_v0  ;;  %v1909_v22 = vpack.c.bf16 %v1901_v15, %v1901_v15 }
 0xa31   :  { %3078 = vmatprep.mubr.msk.bf16.mxu1 %vm3406_vm0, %v3405_v0  ;;  %v3247_v23 = vpop.eup %3246  ;;  %3075 = vmatpush3.bf16.msra.mxu1 %v3168_v21  ;;  %v3176_v21 = vld [vmem:[#allocation10 + $0x90] sm:$0xff]  }
 0xa32   :  { %v1903_v19 = vmul.f32 %v3247_v23, %v3917_v41  ;;  %3076 = vmatprep.subr.bf16.mxu1 %v3405_v0 }
 0xa34   :  { %v1911_v4 = vpack.c.bf16 %v1903_v19, %v1903_v19 }
 0xa35   :  { %3077 = vmatpush3.bf16.msra.mxu1 %v3169_v18 }
 0xa36   :  { %3059 = vmatmul.mubr.msk.bf16.vlgmr.msra.gmra.mrb[72].mxu0 %vm197_vm2, %v1909_v22  ;;  %3090 = vmatprep.subr.bf16.mxu1 %v3405_v0 }
 0xa37   :  { %3069 = vmatpush3.bf16.msra.mxu0 %v2238_v25  ;;  %3070 = vmatprep.mubr.msk.bf16.mxu0 %vm3406_vm0, %v3405_v0 }
 0xa38   :  { %3082 = vmatprep.subr.bf16.mxu0 %v3405_v0 }
 0xa3e   :  { %3071 = vmatmul.mubr.msk.bf16.vlgmr.msra.gmra.mrb[76].mxu0 %vm197_vm2, %v1911_v4 }
 0xa3f   :  { %v1952_v3 = vpop.f32.mrb[52].mxu1  ;;  %3086 = vmatprep.mubr.msk.bf16.mxu0 %vm3406_vm0, %v3405_v0 }
 0xa40   :  { %v3030_v26 = vpop.f32.mrb[53].mxu1 }
 0xa41   :  { %v1955_v27 = vpop.f32.mrb[54].mxu1 }
 0xa42   :  { %v3031_v28 = vpop.f32.mrb[55].mxu1 }
 0xacc   :  { %v1998_v29 = vpop.f32.mrb[64].mxu0 }
 0xacd   :  { %v3036_v31 = vpop.f32.mrb[65].mxu0 }
 0xace   :  { %v2001_v32 = vpop.f32.mrb[66].mxu0 }
 0xacf   :  { %v3037_v34 = vpop.f32.mrb[67].mxu0 }
 0xad1   :  { %v2044_v35 = vpop.f32.mrb[56].mxu1 }
 0xad2   :  { %v3042_v36 = vpop.f32.mrb[57].mxu1 }
 0xad3   :  { %v2047_v37 = vpop.f32.mrb[58].mxu1 }
 0xad4   :  { %v3043_v24 = vpop.f32.mrb[59].mxu1 }
 0xad9   :  { %v2136_v38 = vpop.f32.mrb[60].mxu1 }
 0xada   :  { %v3054_v39 = vpop.f32.mrb[61].mxu1 }
 0xadb   :  { %v2139_v40 = vpop.f32.mrb[62].mxu1  ;;  %v3172_v39 = vld [vmem:[#allocation10 + $0x70] sm:$0xff]  }
 0xadc   :  { %v3055_v42 = vpop.f32.mrb[63].mxu1  ;;  %v3173_v40 = vld [vmem:[#allocation10 + $0x78] sm:$0xff]  }
 0xadd   :  { %v3174_v42 = vld [vmem:[#allocation10 + $0x80] sm:$0xff]  }
 0xb01   :  { %v2090_v43 = vpop.f32.mrb[68].mxu0 }
 0xb02   :  { %v3143_v44 = vpack.i.bf16 %v2090_v43, %v2044_v35  ;;  %v3048_v41 = vpop.f32.mrb[69].mxu0  ;;  %v2228_v45 = vpop.f32.mrb[64].mxu1  ;;  %v3175_v43 = vld [vmem:[#allocation10 + $0x88] sm:$0xff]  }
 0xb03   :  { %v2093_v33 = vpop.f32.mrb[70].mxu0  ;;  %v3066_v47 = vpop.f32.mrb[65].mxu1 }
 0xb04   :  { %v2231_v48 = vpop.f32.mrb[66].mxu1  ;;  %3144 = vrot.lane.b32.xlu1 %v3143_v44, %s3399_s10  ;;  %v3049_v49 = vpop.f32.mrb[71].mxu0  ;;  %v3177_v44 = vld [vmem:[#allocation10 + $0x98] sm:$0xff]  }
 0xb05   :  { %v3067_v14 = vpop.f32.mrb[67].mxu1 }
 0xb09   :  { %v2182_v50 = vpop.f32.mrb[72].mxu0 }
 0xb0a   :  { %v3148_v11 = vpack.i.bf16 %v2182_v50, %v2136_v38  ;;  %v3060_v51 = vpop.f32.mrb[73].mxu0  ;;  %v3170_v38 = vld [vmem:[#allocation10 + $0x60] sm:$0xff]  }
 0xb0b   :  { %v2185_v52 = vpop.f32.mrb[74].mxu0  ;;  %3083 = vmatpush3.bf16.msra.mxu0 %v3170_v38  ;;  %v2723_v50 = vld [vmem:[%s4036_s5 + $0x4] ss:$0 sm:$0xff] }
 0xb0c   :  { %3149 = vrot.lane.b32.xlu0 %v3148_v11, %s3411_s14  ;;  %v3061_v46 = vpop.f32.mrb[75].mxu0  ;;  %3084 = vmatprep.subr.bf16.mxu0 %v3405_v0 }
 0xb0d   :  { %v2724_v46 = vld [vmem:[%s4036_s5 + $0x5] ss:$0 sm:$0xff] }
 0xb11   :  { %v2274_v53 = vpop.f32.mrb[76].mxu0 }
 0xb12   :  { %v3153_v30 = vpack.i.bf16 %v2274_v53, %v2228_v45  ;;  %v3072_v54 = vpop.f32.mrb[77].mxu0 }
 0xb13   :  { %v2277_v55 = vpop.f32.mrb[78].mxu0 }
 0xb14   :  { %3154 = vrot.lane.b32.xlu1 %v3153_v30, %s3412_s15  ;;  %v3073_v56 = vpop.f32.mrb[79].mxu0 }
 0xb15   :  { %v3178_v56 = vld [vmem:[#allocation10 + $0xa0] sm:$0xff]  }
 0xb76   :  { %v3145_v57 = vpop.permute.xlu1 %3144 }
 0xb77   :  { %v3147_v59 = vunpack.i.h.bf16 %v3145_v57  ;;  %v3146_v60 = vunpack.i.l.bf16 %v3145_v57  ;;  %v3179_v57 = vld [vmem:[#allocation10 + $0xa8] sm:$0xff]  }
 0xb79   :  { %v2305_v5 = vsel %vm197_vm2, %v1998_v29, %v3147_v59  ;;  %v2304_v6 = vsel %vm197_vm2, %v1952_v3, %v3146_v60 }
 0xb7e   :  { %v3150_v58 = vpop.permute.xlu0 %3149 }
 0xb7f   :  { %v3152_v61 = vunpack.i.h.bf16 %v3150_v58  ;;  %v3151_v62 = vunpack.i.l.bf16 %v3150_v58  ;;  %v2725_v58 = vld [vmem:[%s4036_s5 + $0x6] ss:$0 sm:$0xff] }
 0xb81   :  { %v2307_v9 = vsel %vm1099_vm6, %v2305_v5, %v3152_v61  ;;  %v2306_v12 = vsel %vm1099_vm6, %v2304_v6, %v3151_v62 }
 0xb86   :  { %v3155_v2 = vpop.permute.xlu1 %3154 }
 0xb87   :  { %v3157_v7 = vunpack.i.h.bf16 %v3155_v2  ;;  %v3156_v8 = vunpack.i.l.bf16 %v3155_v2 }
 0xb89   :  { %v2309_v20 = vsel %vm1102_vm7, %v2307_v9, %v3157_v7  ;;  %v2308_v17 = vsel %vm1102_vm7, %v2306_v12, %v3156_v8 }
 0xb8a   :  { %v2310_v13 = vpack.c.bf16 %v2309_v20, %v2308_v17 }
 0xb8c   :  { %3079 = vmatmul.mubr.msk.bf16.vlgmr.msra.gmra.mrb[68].mxu1 %vm132_vm1, %v2310_v13 }
 0xb8d   :  { %3106 = vmatprep.mubr.msk.bf16.mxu1 %vm3406_vm0, %v3405_v0  ;;  %3091 = vmatpush3.bf16.msra.mxu1 %v3172_v39 }
 0xb8e   :  { %3092 = vmatprep.subr.bf16.mxu1 %v3405_v0 }
 0xb91   :  { %3093 = vmatpush3.bf16.msra.mxu1 %v3173_v40 }
 0xb92   :  { %3094 = vmatprep.subr.bf16.mxu1 %v3405_v0 }
 0xb95   :  { %3095 = vmatpush3.bf16.msra.mxu1 %v3174_v42  ;;  %v2739_v42 = vld [vmem:[%s4036_s5 + $0x9] ss:$0 sm:$0xff] }
 0xb96   :  { %3096 = vmatprep.subr.bf16.mxu1 %v3405_v0 }
 0xb99   :  { %3097 = vmatpush3.bf16.msra.mxu1 %v3175_v43 }
 0xb9a   :  { %3098 = vmatprep.subr.bf16.mxu1 %v3405_v0 }
 0xb9d   :  { %3099 = vmatpush3.bf16.msra.mxu1 %v3176_v21 }
 0xb9e   :  { %3100 = vmatprep.subr.bf16.mxu1 %v3405_v0 }
 0xba1   :  { %3101 = vmatpush3.bf16.msra.mxu1 %v3177_v44 }
 0xba2   :  { %3102 = vmatprep.subr.bf16.mxu1 %v3405_v0 }
 0xba5   :  { %3103 = vmatpush3.bf16.msra.mxu1 %v3178_v56 }
 0xba6   :  { %3104 = vmatprep.subr.bf16.mxu1 %v3405_v0  ;;  %v2729_v0 = vld [vmem:[%s4036_s5 + $0x7] ss:$0 sm:$0xff] }
 0xba9   :  { %3105 = vmatpush3.bf16.msra.mxu1 %v3179_v57 }
 0xc5f   :  { %v2368_v15 = vpop.f32.mrb[68].mxu1 }
 0xc60   :  { %v2369_v16 = vadd.f32 %v2719_v10, %v2368_v15  ;;  %v3080_v22 = vpop.f32.mrb[69].mxu1 }
 0xc61   :  { %v2371_v23 = vpop.f32.mrb[70].mxu1 }
 0xc62   :  { %v2372_v25 = vadd.f32 %v2719_v10, %v2371_v23  ;;  %v3081_v19 = vpop.f32.mrb[71].mxu1  ;;  %v2375_v4 = vadd.f32 %v2369_v16, %v3819_v63 }
 0xc64   :  { %v2377_v3 = vsel %vm132_vm1, %v2375_v4, 0.0  ;;  %v2376_v26 = vadd.f32 %v2372_v25, %v3821_v1  ;;  %v3171_v1 = vld [vmem:[#allocation10 + $0x68] sm:$0xff]  }
 0xc65   :  { %2378 = vadd.xlane.f32.xlu0 %v2377_v3  ;;  %3085 = vmatpush3.bf16.msra.mxu0 %v3171_v1  ;;  %v2738_v1 = vld [vmem:[%s4036_s5 + $0x8] ss:$0 sm:$0xff] }
 0xc66   :  { %v2380_v27 = vsel %vm132_vm1, %v2376_v26, 0.0 }
 0xc67   :  { %2381 = vadd.xlane.f32.xlu1 %v2380_v27 }
 0xcf2   :  { %v2379_v28 = vpop.xlane.xlu0 %2378 }
 0xcf3   :  { %v2383_v29 = vmul.f32 0.03125, %v2379_v28 }
 0xcf4   :  { %v2382_v31 = vpop.xlane.xlu1 %2381 }
 0xcf5   :  { %v2385_v32 = vsub.f32 %v2375_v4, %v2383_v29  ;;  %v2384_v34 = vmul.f32 0.03125, %v2382_v31 }
 0xcf7   :  { %v2386_v35 = vsub.f32 %v2376_v26, %v2384_v34  ;;  %v2387_v36 = vmul.f32 %v2385_v32, %v2385_v32 }
 0xcf9   :  { %v2389_v37 = vsel %vm132_vm1, %v2387_v36, 0.0  ;;  %v2388_v24 = vmul.f32 %v2386_v35, %v2386_v35 }
 0xcfa   :  { %2390 = vadd.xlane.f32.xlu0 %v2389_v37 }
 0xcfb   :  { %v2392_v63 = vsel %vm132_vm1, %v2388_v24, 0.0 }
 0xcfe   :  { %2393 = vadd.xlane.f32.xlu0 %v2392_v63 }
 0xd87   :  { %v2391_v41 = vpop.xlane.xlu0 %2390 }
 0xd88   :  { %v2395_v45 = vmul.f32 0.03125, %v2391_v41 }
 0xd8a   :  { %v2397_v33 = vadd.f32 1e-05, %v2395_v45 }
 0xd8b   :  { %v2394_v47 = vpop.xlane.xlu0 %2393 }
 0xd8c   :  { %3248 = vrsqrt.f32 %v2397_v33  ;;  %v2396_v48 = vmul.f32 0.03125, %v2394_v47 }
 0xd8e   :  { %v2398_v49 = vadd.f32 1e-05, %v2396_v48 }
 0xd90   :  { %3250 = vrsqrt.f32 %v2398_v49 }
 0xd96   :  { %v3249_v14 = vpop.eup %3248 }
 0xd97   :  { %v2401_v18 = vmul.f32 %v3249_v14, %v2385_v32 }
 0xd99   :  { %v2407_v51 = vmul.f32 %v2723_v50, %v2401_v18 }
 0xd9a   :  { %v3251_v11 = vpop.eup %3250 }
 0xd9b   :  { %v2402_v52 = vmul.f32 %v3251_v11, %v2386_v35  ;;  %v2413_v30 = vadd.f32 %v2724_v46, %v2407_v51 }
 0xd9d   :  { %v2408_v53 = vmul.f32 %v2723_v50, %v2402_v52 }
 0xd9f   :  { %v2414_v54 = vadd.f32 %v2724_v46, %v2408_v53 }
 0xda1   :  { %v2415_v55 = vpack.c.bf16 %v2414_v54, %v2413_v30 }
 0xda3   :  { %3087 = vmatmul.mubr.msk.bf16.vlgmr.msra.gmra.mrb[80].mxu0 %vm132_vm1, %v2415_v55 }
 0xe76   :  { %v2473_v59 = vpop.f32.mrb[80].mxu0 }
 0xe77   :  { %v2474_v60 = vadd.f32 %v2725_v58, %v2473_v59  ;;  %v3088_v61 = vpop.f32.mrb[81].mxu0 }
 0xe78   :  { %v2476_v62 = vpop.f32.mrb[82].mxu0 }
 0xe79   :  { %v2477_v2 = vadd.f32 %v2725_v58, %v2476_v62  ;;  %v3089_v5 = vpop.f32.mrb[83].mxu0  ;;  %v2480_v6 = vmax.f32 %v2474_v60, 0.0 }
 0xe7b   :  { %v2481_v7 = vmax.f32 %v2477_v2, 0.0 }
 0xe7d   :  { %v2482_v8 = vpack.c.bf16 %v2481_v7, %v2480_v6 }
 0xe7f   :  { %3107 = vmatmul.mubr.bf16.vlgmr.msra.gmra.mrb[72].mxu1 %v2482_v8 }
 0xf52   :  { %v2585_v9 = vpop.f32.mrb[72].mxu1 }
 0xf53   :  { %v2586_v12 = vadd.f32 %v2729_v0, %v2585_v9  ;;  %v3108_v20 = vpop.f32.mrb[73].mxu1 }
 0xf54   :  { %v2588_v17 = vpop.f32.mrb[74].mxu1 }
 0xf55   :  { %v2589_v13 = vadd.f32 %v2729_v0, %v2588_v17  ;;  %v3109_v10 = vpop.f32.mrb[75].mxu1  ;;  %v2592_v15 = vadd.f32 %v2586_v12, %v2413_v30 }
 0xf57   :  { %v2594_v16 = vsel %vm132_vm1, %v2592_v15, 0.0  ;;  %v2593_v22 = vadd.f32 %v2589_v13, %v2414_v54 }
 0xf58   :  { %2595 = vadd.xlane.f32.xlu1 %v2594_v16 }
 0xf59   :  { %v2597_v23 = vsel %vm132_vm1, %v2593_v22, 0.0 }
 0xf5a   :  { %2598 = vadd.xlane.f32.xlu0 %v2597_v23 }
 0xfe5   :  { %v2596_v25 = vpop.xlane.xlu1 %2595 }
 0xfe6   :  { %v2600_v19 = vmul.f32 0.03125, %v2596_v25 }
 0xfe7   :  { %v2599_v4 = vpop.xlane.xlu0 %2598 }
 0xfe8   :  { %v2602_v3 = vsub.f32 %v2592_v15, %v2600_v19  ;;  %v2601_v26 = vmul.f32 0.03125, %v2599_v4 }
 0xfea   :  { %v2603_v27 = vsub.f32 %v2593_v22, %v2601_v26  ;;  %v2604_v28 = vmul.f32 %v2602_v3, %v2602_v3 }
 0xfec   :  { %v2606_v29 = vsel %vm132_vm1, %v2604_v28, 0.0  ;;  %v2605_v31 = vmul.f32 %v2603_v27, %v2603_v27 }
 0xfed   :  { %2607 = vadd.xlane.f32.xlu1 %v2606_v29 }
 0xfee   :  { %v2609_v32 = vsel %vm132_vm1, %v2605_v31, 0.0 }
 0xfef   :  { %2610 = vadd.xlane.f32.xlu0 %v2609_v32 }
0x107a   :  { %v2608_v34 = vpop.xlane.xlu1 %2607 }
0x107b   :  { %v2612_v35 = vmul.f32 0.03125, %v2608_v34 }
0x107c   :  { %v2611_v36 = vpop.xlane.xlu0 %2610 }
0x107d   :  { %v2614_v37 = vadd.f32 1e-05, %v2612_v35  ;;  %v2613_v24 = vmul.f32 0.03125, %v2611_v36 }
0x107f   :  { %3252 = vrsqrt.f32 %v2614_v37  ;;  %v2615_v63 = vadd.f32 1e-05, %v2613_v24 }
0x1081   :  { %3254 = vrsqrt.f32 %v2615_v63 }
0x1089   :  { %v3253_v38 = vpop.eup %3252 }
0x108a   :  { %v2618_v39 = vmul.f32 %v3253_v38, %v2602_v3 }
0x108b   :  { %v3255_v40 = vpop.eup %3254 }
0x108c   :  { %v2619_v43 = vmul.f32 %v3255_v40, %v2603_v27  ;;  %v2624_v21 = vmul.f32 %v2738_v1, %v2618_v39 }
0x108e   :  { %v2625_v44 = vmul.f32 %v2738_v1, %v2619_v43  ;;  %v2630_v41 = vadd.f32 %v2739_v42, %v2624_v21 }
0x1090   :  { %v2631_v45 = vadd.f32 %v2739_v42, %v2625_v44  ;;  %v2632_v33 = vsel %vm132_vm1, %v2630_v41, 0.0 }
0x1091   :  { %2634 = vst [vmem:[#allocation11] sm:$0xff] %v2632_v33 }
0x1092   :  { %v2633_v47 = vsel %vm132_vm1, %v2631_v45, 0.0 }
0x1093   :  { %2635 = vst [vmem:[#allocation11 + $0x8] sm:$0xff] %v2633_v47 }
0x1094   :  { %3377 = shalt.err (!%p3374_p2)
}
0x1095   :  { %s3378_s13 = scalar_lea.hbm %s4037_s6, 256 }
0x1096   :  { %p3379_p3 = scmp.ne.s32.totalorder %s4037_s6, %s3378_s13  ;;  %p3382_p4 = scmp.lt.u32.totalorder %s3378_s13, %s4037_s6 }
0x1098   :  { %p3384_p5 = pnand %p3382_p4, %p3379_p3 }
0x109a   :  { %3387 = shalt.err (!%p3384_p5)
}
0x109b   :  { %2647 = dma.vmem_to_hbm [thread:$0]  %s2642_s4, 256, %s4037_s6, [#allocation4], %s3398_s9, %s3398_s9, %s3399_s10  }
0x109c   :  { %3394 = dma.done.wait [#allocation4], 256  }
0x109d   :  { %3395 = vsyncadd [#allocation4], 4294967040 }
0x109e   :  { %2651 = vsyncpa [#allocation3], 1 }
0x109f   :  { %2652 = vsyncpa [#allocation6], 1 }
0x10a0   :  { %2653 = vsyncpa [#allocation9], 1 }
0x10a1   :  { %2654 = vsyncpa [#allocation4], 1 }

</bundles_post_ra>
